<compile_context>
chip_gen: v5e
topology: v5e:2x2
jax: 0.10.0
libtpu: 0.0.40
codegen_flags: <defaults>
</compile_context>

<pallas_src>
import functools

import jax
import jax.numpy as jnp
from jax.experimental import pallas as pl
from jax.experimental.pallas import tpu as pltpu


# ----------------------------------------------------------------------------
# Fused kernel: lin_in + num_layers x (message -> aggregate -> update + res) + lin_pred
# ----------------------------------------------------------------------------
def fused_mpnn_kernel(
    counts_ref,                                   # SMEM (2,) int32: [n_valid, e_valid]
    x_ref, win_ref, bin_ref,                      # node input + lin_in
    src_ref, tgt_ref, tgt_row_ref, ea_ref,        # graph structure + edge features
    wm1n_ref, wm1e_ref, wm2_ref,                  # per-layer message weights
    wu1_ref, wu2_ref,                             # per-layer update weights
    wpred_ref, bpred_ref,                         # lin_pred
    out_ref,
    h_ref, s_ref, t_ref, tt_ref,                  # VMEM scratch (resident across layers)
):
    f32 = jnp.float32
    bf16 = jnp.bfloat16
    l = pl.program_id(0)

    n_pad, D = h_ref.shape
    e_pad = s_ref.shape[0]

    n_valid = counts_ref[0]
    e_valid = counts_ref[1]
    inv_n = 1.0 / jnp.maximum(n_valid, 1).astype(f32)
    inv_e = 1.0 / jnp.maximum(e_valid, 1).astype(f32)

    # Valid-row masks; padded rows must not pollute BatchNorm statistics.
    node_mask = (jax.lax.broadcasted_iota(jnp.int32, (n_pad, 1), 0) < n_valid).astype(f32)
    edge_mask = (jax.lax.broadcasted_iota(jnp.int32, (e_pad, 1), 0) < e_valid).astype(f32)

    def bn_relu(z, inv_count, row_mask):
        # Single-pass masked BatchNorm1d (train mode, gamma=1, beta=0, biased var) + ReLU.
        zm = z * row_mask
        s1 = jnp.sum(zm, axis=0, keepdims=True)
        s2 = jnp.sum(zm * zm, axis=0, keepdims=True)
        mean = s1 * inv_count
        var = jnp.maximum(s2 * inv_count - mean * mean, 0.0)
        zhat = (z - mean) * jax.lax.rsqrt(var + 1e-5)
        return jnp.maximum(zhat, 0.0) * row_mask

    def mm(a_bf, w_bf):
        # bf16 MXU matmul, f32 accumulation.
        return jnp.dot(a_bf, w_bf, preferred_element_type=f32)

    # --- layer 0: lin_in + cache one-hot gather/scatter matrices in VMEM -----
    @pl.when(l == 0)
    def _():
        h0 = mm(x_ref[...].astype(bf16), win_ref[...].astype(bf16)) + bin_ref[...]
        h_ref[...] = h0 * node_mask

        col_n = jax.lax.broadcasted_iota(jnp.int32, (e_pad, n_pad), 1)
        row_e = jax.lax.broadcasted_iota(jnp.int32, (e_pad, n_pad), 0)
        edge_ok = row_e < e_valid
        # Rows for padded edges are zeroed so gather AND scatter ignore them.
        # (bool -> f32 -> bf16 cast chain kept for lowering safety; runs once only.)
        s_ref[...] = jnp.logical_and(col_n == src_ref[...], edge_ok).astype(f32).astype(bf16)
        t_ref[...] = jnp.logical_and(col_n == tgt_ref[...], edge_ok).astype(f32).astype(bf16)

        row_n = jax.lax.broadcasted_iota(jnp.int32, (n_pad, e_pad), 0)
        col_e = jax.lax.broadcasted_iota(jnp.int32, (n_pad, e_pad), 1)
        tt_ref[...] = jnp.logical_and(
            row_n == tgt_row_ref[...], col_e < e_valid).astype(f32).astype(bf16)

    h = h_ref[...]                          # (n_pad, D) f32, resident
    h_b = h.astype(bf16)

    # --- message MLP: Linear-1 hoisted to the node side -----------------------
    # hW = h @ [W1i | W1j]  (one (D, 2D) matmul), then gather per edge.
    hW = mm(h_b, wm1n_ref[...])             # (n_pad, 2D) f32
    hWi_b = hW[:, :D].astype(bf16)
    hWj_b = hW[:, D:].astype(bf16)
    z = (mm(t_ref[...], hWi_b)              # destination-node term
         + mm(s_ref[...], hWj_b)            # source-node term
         + mm(ea_ref[...].astype(bf16), wm1e_ref[...].astype(bf16)))   # edge term
    z = bn_relu(z, inv_e, edge_mask)
    msg = bn_relu(mm(z.astype(bf16), wm2_ref[...]), inv_e, edge_mask)  # (e_pad, D)

    # --- aggregate (scatter-add) via the pre-transposed one-hot ---------------
    aggr = mm(tt_ref[...], msg.astype(bf16))                           # (n_pad, D)

    # --- update MLP: single K=2D contraction -----------------------------------
    ha_b = jnp.concatenate([h_b, aggr.astype(bf16)], axis=1)           # (n_pad, 2D)
    u = bn_relu(mm(ha_b, wu1_ref[...]), inv_n, node_mask)
    u = bn_relu(mm(u.astype(bf16), wu2_ref[...]), inv_n, node_mask)

    h_new = h + u                           # residual: h = h + conv(h, ...)
    h_ref[...] = h_new

    # --- last layer: lin_pred into lane-dense padded output block -------------
    @pl.when(l == pl.num_programs(0) - 1)
    def _():
        out_ref[...] = mm(h_new.astype(bf16), wpred_ref[...].astype(bf16)) + bpred_ref[...]


# ----------------------------------------------------------------------------
# Parameter init (PyTorch-Linear-style uniform), padded + layer-stacked layout
# ----------------------------------------------------------------------------
def _uniform(key, shape, bound):
    return jax.random.uniform(key, shape, jnp.float32, -bound, bound)


def _pad_to(a, shape):
    out = jnp.zeros(shape, a.dtype)
    return out.at[tuple(slice(0, s) for s in a.shape)].set(a)


def init_params(key, num_layers=4, emb_dim=64, in_dim=6, edge_dim=1, out_dim=1,
                d_pad=128, in_pad=8, edge_pad=8, out_pad=128):
    keys = jax.random.split(key, 2 + num_layers)

    kw, kb = jax.random.split(keys[0])
    bnd = 1.0 / (in_dim ** 0.5)
    w_in = _pad_to(_uniform(kw, (in_dim, emb_dim), bnd), (in_pad, d_pad))
    b_in = _pad_to(_uniform(kb, (1, emb_dim), bnd), (1, d_pad))

    kw, kb = jax.random.split(keys[1])
    bnd = 1.0 / (emb_dim ** 0.5)
    w_pred = _pad_to(_uniform(kw, (emb_dim, out_dim), bnd), (d_pad, out_pad))
    b_pred = _pad_to(_uniform(kb, (1, out_dim), bnd), (1, out_pad))

    wm1n, wm1e, wm2, wu1, wu2 = ([] for _ in range(5))
    for layer in range(num_layers):
        k1, k2, k3, k4 = jax.random.split(keys[2 + layer], 4)
        d = emb_dim
        # mlp_msg Linear1 (fan_in = 2d + edge_dim); its bias is inert under BN.
        bnd = 1.0 / ((2 * d + edge_dim) ** 0.5)
        wm1 = _uniform(k1, (2 * d + edge_dim, d), bnd)
        wm1n.append(jnp.concatenate(
            [_pad_to(wm1[:d], (d_pad, d_pad)),           # multiplies h_i (dest)
             _pad_to(wm1[d:2 * d], (d_pad, d_pad))],     # multiplies h_j (src)
            axis=1))                                      # (d_pad, 2*d_pad)
        wm1e.append(_pad_to(wm1[2 * d:], (edge_pad, d_pad)))
        # mlp_msg Linear2
        bnd = 1.0 / (d ** 0.5)
        wm2.append(_pad_to(_uniform(k2, (d, d), bnd), (d_pad, d_pad)))
        # mlp_upd Linear1 (fan_in = 2d): stacked along K -> one 2*d_pad-deep matmul.
        bnd = 1.0 / ((2 * d) ** 0.5)
        wu1_full = _uniform(k3, (2 * d, d), bnd)
        wu1.append(jnp.concatenate(
            [_pad_to(wu1_full[:d], (d_pad, d_pad)),       # multiplies h
             _pad_to(wu1_full[d:], (d_pad, d_pad))],      # multiplies aggr
            axis=0))                                       # (2*d_pad, d_pad)
        # mlp_upd Linear2
        bnd = 1.0 / (d ** 0.5)
        wu2.append(_pad_to(_uniform(k4, (d, d), bnd), (d_pad, d_pad)))

    stack_bf16 = lambda xs: jnp.stack(xs, axis=0).astype(jnp.bfloat16)
    return dict(
        w_in=w_in, b_in=b_in, w_pred=w_pred, b_pred=b_pred,
        wm1n=stack_bf16(wm1n),                  # (L, d_pad, 2*d_pad) bf16
        wm1e=jnp.stack(wm1e, axis=0),           # (L, edge_pad, d_pad) f32 (tiny)
        wm2=stack_bf16(wm2),                    # (L, d_pad, d_pad)  bf16
        wu1=stack_bf16(wu1),                    # (L, 2*d_pad, d_pad) bf16
        wu2=stack_bf16(wu2),                    # (L, d_pad, d_pad)  bf16
    )


# ----------------------------------------------------------------------------
# Full model forward: padding/glue in JAX, all compute in the single fused kernel
# ----------------------------------------------------------------------------
def _round_up(v, m):
    return ((v + m - 1) // m) * m


def _vmem_cap_bytes():
    try:
        info = pltpu.get_tpu_info()
        cap = getattr(info, "vmem_capacity_bytes", None)
        if cap:
            return int(cap)
    except Exception:
        pass
    return 64 * 1024 * 1024   # conservative: v7x per-TensorCore VMEM


@functools.partial(jax.jit, static_argnames=("out_dim",))
def mpnn_model_forward(params, x, edge_index, edge_attr, *, out_dim=1):
    n, _ = x.shape
    e = edge_index.shape[1]
    L, D, _ = params["wm2"].shape
    in_pad = params["w_in"].shape[0]
    edge_pad = params["wm1e"].shape[1]
    out_pad = params["w_pred"].shape[1]

    n_pad = _round_up(max(n, 8), 8)
    e_pad = _round_up(max(e, 8), 8)

    # Zero-pad rows/feature dims (BN uses masked statistics inside the kernel).
    counts = jnp.array([n, e], jnp.int32)
    x_p = jnp.zeros((n_pad, in_pad), jnp.float32).at[:n, :x.shape[1]].set(
        x.astype(jnp.float32))
    src = jnp.zeros((e_pad, 1), jnp.int32).at[:e, 0].set(edge_index[0].astype(jnp.int32))
    tgt = jnp.zeros((e_pad, 1), jnp.int32).at[:e, 0].set(edge_index[1].astype(jnp.int32))
    tgt_row = jnp.zeros((1, e_pad), jnp.int32).at[0, :e].set(edge_index[1].astype(jnp.int32))
    ea_p = jnp.zeros((e_pad, edge_pad), jnp.float32).at[:e, :edge_attr.shape[1]].set(
        edge_attr.astype(jnp.float32))

    const2 = lambda l: (0, 0)           # resident across the layer axis
    stacked3 = lambda l: (l, 0, 0)      # per-layer weight slab

    in_specs = [
        pl.BlockSpec(memory_space=pltpu.MemorySpace.SMEM),   # counts [n, e]
        pl.BlockSpec((n_pad, in_pad), const2),               # x
        pl.BlockSpec((in_pad, D), const2),                   # w_in
        pl.BlockSpec((1, D), const2),                        # b_in
        pl.BlockSpec((e_pad, 1), const2),                    # src indices j (column)
        pl.BlockSpec((e_pad, 1), const2),                    # tgt indices i (column)
        pl.BlockSpec((1, e_pad), const2),                    # tgt indices i (row, for T^T)
        pl.BlockSpec((e_pad, edge_pad), const2),             # edge_attr
        pl.BlockSpec((None, D, 2 * D), stacked3),            # wm1n  (bf16)
        pl.BlockSpec((None, edge_pad, D), stacked3),         # wm1e  (f32, tiny)
        pl.BlockSpec((None, D, D), stacked3),                # wm2   (bf16)
        pl.BlockSpec((None, 2 * D, D), stacked3),            # wu1   (bf16)
        pl.BlockSpec((None, D, D), stacked3),                # wu2   (bf16)
        pl.BlockSpec((D, out_pad), const2),                  # w_pred
        pl.BlockSpec((1, out_pad), const2),                  # b_pred
    ]

    # VMEM budget derived from actual buffer sizes (double-buffered blocks + scratch),
    # capped against the chip's physical VMEM so it stays v7x-safe.
    scratch_bytes = n_pad * D * 4 + 3 * e_pad * n_pad * 2
    block_bytes = (
        n_pad * in_pad * 4 + in_pad * D * 4 + D * 4          # x, w_in, b_in
        + 2 * e_pad * 4 + e_pad * 4 + e_pad * edge_pad * 4   # src, tgt, tgt_row, ea
        + (D * 2 * D + D * D + 2 * D * D + D * D) * 2        # bf16 per-layer weights
        + edge_pad * D * 4                                   # wm1e (f32)
        + D * out_pad * 4 + out_pad * 4                      # w_pred, b_pred
        + n_pad * out_pad * 4                                # output block
    )
    vmem_limit = max(scratch_bytes + 2 * block_bytes + (8 << 20), 32 << 20)
    vmem_limit = min(vmem_limit, (3 * _vmem_cap_bytes()) // 4)

    out = pl.pallas_call(
        fused_mpnn_kernel,
        out_shape=jax.ShapeDtypeStruct((n_pad, out_pad), jnp.float32),
        grid=(L,),
        in_specs=in_specs,
        out_specs=pl.BlockSpec((n_pad, out_pad), const2),
        scratch_shapes=[
            pltpu.VMEM((n_pad, D), jnp.float32),        # resident node features h
            pltpu.VMEM((e_pad, n_pad), jnp.bfloat16),   # S  (source one-hot), built once
            pltpu.VMEM((e_pad, n_pad), jnp.bfloat16),   # T  (target one-hot), built once
            pltpu.VMEM((n_pad, e_pad), jnp.bfloat16),   # T^T (scatter),       built once
        ],
        compiler_params=pltpu.CompilerParams(
            dimension_semantics=("arbitrary",),          # layers are sequential
            vmem_limit_bytes=int(vmem_limit),
        ),
    )(counts, x_p, params["w_in"], params["b_in"], src, tgt, tgt_row, ea_p,
      params["wm1n"], params["wm1e"], params["wm2"], params["wu1"], params["wu2"],
      params["w_pred"], params["b_pred"])

    return out[:n, :out_dim].reshape(-1)               # out.view(-1)


if __name__ == "__main__":
    key = jax.random.PRNGKey(0)
    n_nodes, n_edges = 8, 16
    in_dim, emb_dim, edge_dim, out_dim, num_layers = 6, 64, 1, 1, 4

    k1, k2, k3, k4 = jax.random.split(key, 4)
    x = jax.random.normal(k1, (n_nodes, in_dim), jnp.float32)
    edge_index = jax.random.randint(k2, (2, n_edges), 0, n_nodes, dtype=jnp.int32)
    edge_attr = jax.random.normal(k3, (n_edges, edge_dim), jnp.float32)

    params = init_params(k4, num_layers, emb_dim, in_dim, edge_dim, out_dim)

    out = mpnn_model_forward(params, x, edge_index, edge_attr, out_dim=out_dim)
    out = jax.block_until_ready(out)
    assert out.shape == (n_nodes,) and out.dtype == jnp.float32
    assert bool(jnp.all(jnp.isfinite(out)))
    print("KERNEL_OK")
</pallas_src>

<mosaic_0001>
module attributes {stable_mosaic.version = 11 : i64} {
  func.func @fused_mpnn_kernel(%arg0: i32, %arg1: memref<2xi32, #tpu.memory_space<smem>>, %arg2: memref<8x8xf32, #tpu.memory_space<vmem>>, %arg3: memref<8x128xf32, #tpu.memory_space<vmem>>, %arg4: memref<1x128xf32, #tpu.memory_space<vmem>>, %arg5: memref<16x1xi32, #tpu.memory_space<vmem>>, %arg6: memref<16x1xi32, #tpu.memory_space<vmem>>, %arg7: memref<1x16xi32, #tpu.memory_space<vmem>>, %arg8: memref<16x8xf32, #tpu.memory_space<vmem>>, %arg9: memref<1x128x256xbf16, #tpu.memory_space<vmem>>, %arg10: memref<1x8x128xf32, #tpu.memory_space<vmem>>, %arg11: memref<1x128x128xbf16, #tpu.memory_space<vmem>>, %arg12: memref<1x256x128xbf16, #tpu.memory_space<vmem>>, %arg13: memref<1x128x128xbf16, #tpu.memory_space<vmem>>, %arg14: memref<128x128xf32, #tpu.memory_space<vmem>>, %arg15: memref<1x128xf32, #tpu.memory_space<vmem>>, %arg16: memref<8x128xf32, #tpu.memory_space<vmem>>, %arg17: memref<8x128xf32, #tpu.memory_space<vmem>>, %arg18: memref<16x8xbf16, #tpu.memory_space<vmem>>, %arg19: memref<16x8xbf16, #tpu.memory_space<vmem>>, %arg20: memref<8x16xbf16, #tpu.memory_space<vmem>>) attributes {dimension_semantics = [#tpu.dimension_semantics<arbitrary>], iteration_bounds = array<i64: 4>, scalar_prefetch = 0 : i64, scratch_operands = 4 : i64, tpu.core_type = #tpu.core_type<tc>, window_params = [{transform_indices = @transform_0, window_bounds = array<i64: 2>}, {pipeline_mode = #tpu.pipeline_mode<synchronous>, transform_indices = @transform_1, window_bounds = array<i64: 8, 8>}, {pipeline_mode = #tpu.pipeline_mode<synchronous>, transform_indices = @transform_2, window_bounds = array<i64: 8, 128>}, {pipeline_mode = #tpu.pipeline_mode<synchronous>, transform_indices = @transform_3, window_bounds = array<i64: 1, 128>}, {pipeline_mode = #tpu.pipeline_mode<synchronous>, transform_indices = @transform_4, window_bounds = array<i64: 16, 1>}, {pipeline_mode = #tpu.pipeline_mode<synchronous>, transform_indices = @transform_5, window_bounds = array<i64: 16, 1>}, {pipeline_mode = #tpu.pipeline_mode<synchronous>, transform_indices = @transform_6, window_bounds = array<i64: 1, 16>}, {pipeline_mode = #tpu.pipeline_mode<synchronous>, transform_indices = @transform_7, window_bounds = array<i64: 16, 8>}, {transform_indices = @transform_8, window_bounds = array<i64: 1, 128, 256>}, {transform_indices = @transform_9, window_bounds = array<i64: 1, 8, 128>}, {transform_indices = @transform_10, window_bounds = array<i64: 1, 128, 128>}, {transform_indices = @transform_11, window_bounds = array<i64: 1, 256, 128>}, {transform_indices = @transform_12, window_bounds = array<i64: 1, 128, 128>}, {pipeline_mode = #tpu.pipeline_mode<synchronous>, transform_indices = @transform_13, window_bounds = array<i64: 128, 128>}, {pipeline_mode = #tpu.pipeline_mode<synchronous>, transform_indices = @transform_14, window_bounds = array<i64: 1, 128>}, {pipeline_mode = #tpu.pipeline_mode<synchronous>, transform_indices = @transform_15, window_bounds = array<i64: 8, 128>}]} {
    %c0 = arith.constant 0 : index
    %0 = memref.load %arg1[%c0] : memref<2xi32, #tpu.memory_space<smem>>
    %c1 = arith.constant 1 : index
    %1 = memref.load %arg1[%c1] : memref<2xi32, #tpu.memory_space<smem>>
    %c1_i32 = arith.constant 1 : i32
    %2 = arith.maxsi %0, %c1_i32 : i32
    %3 = arith.sitofp %2 : i32 to f32
    %cst = arith.constant 1.000000e+00 : f32
    %4 = arith.divf %cst, %3 : f32
    %c1_i32_0 = arith.constant 1 : i32
    %5 = arith.maxsi %1, %c1_i32_0 : i32
    %6 = arith.sitofp %5 : i32 to f32
    %cst_1 = arith.constant 1.000000e+00 : f32
    %7 = arith.divf %cst_1, %6 : f32
    %8 = tpu.iota {dimensions = array<i32: 0>} : vector<8x1xi32>
    %9 = vector.broadcast %0 : i32 to vector<8x1xi32>
    %10 = arith.cmpi slt, %8, %9 : vector<8x1xi32>
    %11 = arith.extui %10 : vector<8x1xi1> to vector<8x1xi32>
    %12 = arith.sitofp %11 : vector<8x1xi32> to vector<8x1xf32>
    %13 = tpu.iota {dimensions = array<i32: 0>} : vector<16x1xi32>
    %14 = vector.broadcast %1 : i32 to vector<16x1xi32>
    %15 = arith.cmpi slt, %13, %14 : vector<16x1xi32>
    %16 = arith.extui %15 : vector<16x1xi1> to vector<16x1xi32>
    %17 = arith.sitofp %16 : vector<16x1xi32> to vector<16x1xf32>
    %c0_i32 = arith.constant 0 : i32
    %18 = arith.cmpi eq, %arg0, %c0_i32 : i32
    %19 = arith.extui %18 : i1 to i32
    %c0_i32_2 = arith.constant 0 : i32
    %20 = arith.cmpi ne, %19, %c0_i32_2 : i32
    scf.if %20 {
      %c0_59 = arith.constant 0 : index
      %c0_60 = arith.constant 0 : index
      %167 = vector.load %arg2[%c0_59, %c0_60] : memref<8x8xf32, #tpu.memory_space<vmem>>, vector<8x8xf32>
      %168 = arith.truncf %167 : vector<8x8xf32> to vector<8x8xbf16>
      %c0_61 = arith.constant 0 : index
      %c0_62 = arith.constant 0 : index
      %169 = vector.load %arg3[%c0_61, %c0_62] : memref<8x128xf32, #tpu.memory_space<vmem>>, vector<8x128xf32>
      %170 = arith.truncf %169 : vector<8x128xf32> to vector<8x128xbf16>
      %cst_63 = arith.constant dense<0.000000e+00> : vector<8x128xf32>
      %171 = tpu.matmul %168, %170, %cst_63 {dimension_numbers = #tpu.dot_dimension_numbers<[1], [0], [0], [1], [0, 0, 1, 1], [], []>} : vector<8x8xbf16>, vector<8x128xbf16>, vector<8x128xf32> -> vector<8x128xf32>
      %c0_64 = arith.constant 0 : index
      %c0_65 = arith.constant 0 : index
      %172 = vector.load %arg4[%c0_64, %c0_65] : memref<1x128xf32, #tpu.memory_space<vmem>>, vector<1x128xf32>
      %173 = vector.broadcast %172 : vector<1x128xf32> to vector<8x128xf32>
      %174 = arith.addf %171, %173 : vector<8x128xf32>
      %175 = vector.broadcast %12 : vector<8x1xf32> to vector<8x128xf32>
      %176 = arith.mulf %174, %175 : vector<8x128xf32>
      %c0_66 = arith.constant 0 : index
      %c0_67 = arith.constant 0 : index
      %177 = vector.load %arg17[%c0_66, %c0_67] : memref<8x128xf32, #tpu.memory_space<vmem>>, vector<8x128xf32>
      tpu.vector_store %arg17[%c0_66, %c0_67], %176 {strides = array<i32>} : memref<8x128xf32, #tpu.memory_space<vmem>>, vector<8x128xf32>,
      %178 = tpu.iota {dimensions = array<i32: 1>} : vector<16x8xi32>
      %179 = tpu.iota {dimensions = array<i32: 0>} : vector<16x8xi32>
      %180 = vector.broadcast %1 : i32 to vector<16x8xi32>
      %181 = arith.cmpi slt, %179, %180 : vector<16x8xi32>
      %c0_68 = arith.constant 0 : index
      %c0_69 = arith.constant 0 : index
      %182 = vector.load %arg5[%c0_68, %c0_69] : memref<16x1xi32, #tpu.memory_space<vmem>>, vector<16x1xi32>
      %183 = vector.broadcast %182 : vector<16x1xi32> to vector<16x8xi32>
      %184 = arith.cmpi eq, %178, %183 : vector<16x8xi32>
      %185 = arith.andi %184, %181 : vector<16x8xi1>
      %186 = arith.extui %185 : vector<16x8xi1> to vector<16x8xi32>
      %187 = arith.sitofp %186 : vector<16x8xi32> to vector<16x8xf32>
      %188 = arith.truncf %187 : vector<16x8xf32> to vector<16x8xbf16>
      %c0_70 = arith.constant 0 : index
      %c0_71 = arith.constant 0 : index
      %189 = vector.load %arg18[%c0_70, %c0_71] : memref<16x8xbf16, #tpu.memory_space<vmem>>, vector<16x8xbf16>
      tpu.vector_store %arg18[%c0_70, %c0_71], %188 {strides = array<i32>} : memref<16x8xbf16, #tpu.memory_space<vmem>>, vector<16x8xbf16>,
      %c0_72 = arith.constant 0 : index
      %c0_73 = arith.constant 0 : index
      %190 = vector.load %arg6[%c0_72, %c0_73] : memref<16x1xi32, #tpu.memory_space<vmem>>, vector<16x1xi32>
      %191 = vector.broadcast %190 : vector<16x1xi32> to vector<16x8xi32>
      %192 = arith.cmpi eq, %178, %191 : vector<16x8xi32>
      %193 = arith.andi %192, %181 : vector<16x8xi1>
      %194 = arith.extui %193 : vector<16x8xi1> to vector<16x8xi32>
      %195 = arith.sitofp %194 : vector<16x8xi32> to vector<16x8xf32>
      %196 = arith.truncf %195 : vector<16x8xf32> to vector<16x8xbf16>
      %c0_74 = arith.constant 0 : index
      %c0_75 = arith.constant 0 : index
      %197 = vector.load %arg19[%c0_74, %c0_75] : memref<16x8xbf16, #tpu.memory_space<vmem>>, vector<16x8xbf16>
      tpu.vector_store %arg19[%c0_74, %c0_75], %196 {strides = array<i32>} : memref<16x8xbf16, #tpu.memory_space<vmem>>, vector<16x8xbf16>,
      %198 = tpu.iota {dimensions = array<i32: 0>} : vector<8x16xi32>
      %199 = tpu.iota {dimensions = array<i32: 1>} : vector<8x16xi32>
      %c0_76 = arith.constant 0 : index
      %c0_77 = arith.constant 0 : index
      %200 = vector.load %arg7[%c0_76, %c0_77] : memref<1x16xi32, #tpu.memory_space<vmem>>, vector<1x16xi32>
      %201 = vector.broadcast %200 : vector<1x16xi32> to vector<8x16xi32>
      %202 = arith.cmpi eq, %198, %201 : vector<8x16xi32>
      %203 = vector.broadcast %1 : i32 to vector<8x16xi32>
      %204 = arith.cmpi slt, %199, %203 : vector<8x16xi32>
      %205 = arith.andi %202, %204 : vector<8x16xi1>
      %206 = arith.extui %205 : vector<8x16xi1> to vector<8x16xi32>
      %207 = arith.sitofp %206 : vector<8x16xi32> to vector<8x16xf32>
      %208 = arith.truncf %207 : vector<8x16xf32> to vector<8x16xbf16>
      %c0_78 = arith.constant 0 : index
      %c0_79 = arith.constant 0 : index
      %209 = vector.load %arg20[%c0_78, %c0_79] : memref<8x16xbf16, #tpu.memory_space<vmem>>, vector<8x16xbf16>
      tpu.vector_store %arg20[%c0_78, %c0_79], %208 {strides = array<i32>} : memref<8x16xbf16, #tpu.memory_space<vmem>>, vector<8x16xbf16>,
    } else {
    }
    %c0_3 = arith.constant 0 : index
    %c0_4 = arith.constant 0 : index
    %21 = vector.load %arg17[%c0_3, %c0_4] : memref<8x128xf32, #tpu.memory_space<vmem>>, vector<8x128xf32>
    %22 = arith.truncf %21 : vector<8x128xf32> to vector<8x128xbf16>
    %c0_5 = arith.constant 0 : index
    %c0_6 = arith.constant 0 : index
    %c0_7 = arith.constant 0 : index
    %23 = vector.load %arg9[%c0_5, %c0_6, %c0_7] : memref<1x128x256xbf16, #tpu.memory_space<vmem>>, vector<1x128x256xbf16>
    %24 = vector.shape_cast %23 : vector<1x128x256xbf16> to vector<128x256xbf16>
    %cst_8 = arith.constant dense<0.000000e+00> : vector<8x256xf32>
    %25 = tpu.matmul %22, %24, %cst_8 {dimension_numbers = #tpu.dot_dimension_numbers<[1], [0], [0], [1], [0, 0, 1, 1], [], []>} : vector<8x128xbf16>, vector<128x256xbf16>, vector<8x256xf32> -> vector<8x256xf32>
    %26 = vector.extract_strided_slice %25 {offsets = [0, 0], sizes = [8, 128], strides = [1, 1]} : vector<8x256xf32> to vector<8x128xf32>
    %27 = arith.truncf %26 : vector<8x128xf32> to vector<8x128xbf16>
    %28 = vector.extract_strided_slice %25 {offsets = [0, 128], sizes = [8, 128], strides = [1, 1]} : vector<8x256xf32> to vector<8x128xf32>
    %29 = arith.truncf %28 : vector<8x128xf32> to vector<8x128xbf16>
    %c0_9 = arith.constant 0 : index
    %c0_10 = arith.constant 0 : index
    %30 = vector.load %arg19[%c0_9, %c0_10] : memref<16x8xbf16, #tpu.memory_space<vmem>>, vector<16x8xbf16>
    %cst_11 = arith.constant dense<0.000000e+00> : vector<16x128xf32>
    %31 = tpu.matmul %30, %27, %cst_11 {dimension_numbers = #tpu.dot_dimension_numbers<[1], [0], [0], [1], [0, 0, 1, 1], [], []>} : vector<16x8xbf16>, vector<8x128xbf16>, vector<16x128xf32> -> vector<16x128xf32>
    %c0_12 = arith.constant 0 : index
    %c0_13 = arith.constant 0 : index
    %32 = vector.load %arg18[%c0_12, %c0_13] : memref<16x8xbf16, #tpu.memory_space<vmem>>, vector<16x8xbf16>
    %cst_14 = arith.constant dense<0.000000e+00> : vector<16x128xf32>
    %33 = tpu.matmul %32, %29, %cst_14 {dimension_numbers = #tpu.dot_dimension_numbers<[1], [0], [0], [1], [0, 0, 1, 1], [], []>} : vector<16x8xbf16>, vector<8x128xbf16>, vector<16x128xf32> -> vector<16x128xf32>
    %34 = arith.addf %31, %33 : vector<16x128xf32>
    %c0_15 = arith.constant 0 : index
    %c0_16 = arith.constant 0 : index
    %35 = vector.load %arg8[%c0_15, %c0_16] : memref<16x8xf32, #tpu.memory_space<vmem>>, vector<16x8xf32>
    %36 = arith.truncf %35 : vector<16x8xf32> to vector<16x8xbf16>
    %c0_17 = arith.constant 0 : index
    %c0_18 = arith.constant 0 : index
    %c0_19 = arith.constant 0 : index
    %37 = vector.load %arg10[%c0_17, %c0_18, %c0_19] : memref<1x8x128xf32, #tpu.memory_space<vmem>>, vector<1x8x128xf32>
    %38 = vector.shape_cast %37 : vector<1x8x128xf32> to vector<8x128xf32>
    %39 = arith.truncf %38 : vector<8x128xf32> to vector<8x128xbf16>
    %cst_20 = arith.constant dense<0.000000e+00> : vector<16x128xf32>
    %40 = tpu.matmul %36, %39, %cst_20 {dimension_numbers = #tpu.dot_dimension_numbers<[1], [0], [0], [1], [0, 0, 1, 1], [], []>} : vector<16x8xbf16>, vector<8x128xbf16>, vector<16x128xf32> -> vector<16x128xf32>
    %41 = arith.addf %34, %40 : vector<16x128xf32>
    %42 = vector.broadcast %17 : vector<16x1xf32> to vector<16x128xf32>
    %43 = arith.mulf %41, %42 : vector<16x128xf32>
    %cst_21 = arith.constant dense<0.000000e+00> : vector<128xf32>
    %44 = vector.multi_reduction <add>, %43, %cst_21 [0] : vector<16x128xf32> to vector<128xf32>
    %45 = vector.shape_cast %44 : vector<128xf32> to vector<1x128xf32>
    %46 = arith.mulf %43, %43 : vector<16x128xf32>
    %cst_22 = arith.constant dense<0.000000e+00> : vector<128xf32>
    %47 = vector.multi_reduction <add>, %46, %cst_22 [0] : vector<16x128xf32> to vector<128xf32>
    %48 = vector.shape_cast %47 : vector<128xf32> to vector<1x128xf32>
    %49 = vector.broadcast %7 : f32 to vector<1x128xf32>
    %50 = arith.mulf %45, %49 : vector<1x128xf32>
    %51 = vector.broadcast %7 : f32 to vector<1x128xf32>
    %52 = arith.mulf %48, %51 : vector<1x128xf32>
    %53 = arith.mulf %50, %50 : vector<1x128xf32>
    %54 = arith.subf %52, %53 : vector<1x128xf32>
    %cst_23 = arith.constant 0.000000e+00 : f32
    %55 = vector.broadcast %cst_23 : f32 to vector<1x128xf32>
    %56 = arith.maximumf %54, %55 : vector<1x128xf32>
    %57 = vector.broadcast %50 : vector<1x128xf32> to vector<16x128xf32>
    %58 = arith.subf %41, %57 : vector<16x128xf32>
    %cst_24 = arith.constant 9.99999974E-6 : f32
    %59 = vector.broadcast %cst_24 : f32 to vector<1x128xf32>
    %60 = arith.addf %56, %59 : vector<1x128xf32>
    %61 = math.rsqrt %60 : vector<1x128xf32>
    %62 = vector.broadcast %61 : vector<1x128xf32> to vector<16x128xf32>
    %63 = arith.mulf %58, %62 : vector<16x128xf32>
    %cst_25 = arith.constant 0.000000e+00 : f32
    %64 = vector.broadcast %cst_25 : f32 to vector<16x128xf32>
    %65 = arith.maximumf %63, %64 : vector<16x128xf32>
    %66 = vector.broadcast %17 : vector<16x1xf32> to vector<16x128xf32>
    %67 = arith.mulf %65, %66 : vector<16x128xf32>
    %68 = arith.truncf %67 : vector<16x128xf32> to vector<16x128xbf16>
    %c0_26 = arith.constant 0 : index
    %c0_27 = arith.constant 0 : index
    %c0_28 = arith.constant 0 : index
    %69 = vector.load %arg11[%c0_26, %c0_27, %c0_28] : memref<1x128x128xbf16, #tpu.memory_space<vmem>>, vector<1x128x128xbf16>
    %70 = vector.shape_cast %69 : vector<1x128x128xbf16> to vector<128x128xbf16>
    %cst_29 = arith.constant dense<0.000000e+00> : vector<16x128xf32>
    %71 = tpu.matmul %68, %70, %cst_29 {dimension_numbers = #tpu.dot_dimension_numbers<[1], [0], [0], [1], [0, 0, 1, 1], [], []>} : vector<16x128xbf16>, vector<128x128xbf16>, vector<16x128xf32> -> vector<16x128xf32>
    %72 = vector.broadcast %17 : vector<16x1xf32> to vector<16x128xf32>
    %73 = arith.mulf %71, %72 : vector<16x128xf32>
    %cst_30 = arith.constant dense<0.000000e+00> : vector<128xf32>
    %74 = vector.multi_reduction <add>, %73, %cst_30 [0] : vector<16x128xf32> to vector<128xf32>
    %75 = vector.shape_cast %74 : vector<128xf32> to vector<1x128xf32>
    %76 = arith.mulf %73, %73 : vector<16x128xf32>
    %cst_31 = arith.constant dense<0.000000e+00> : vector<128xf32>
    %77 = vector.multi_reduction <add>, %76, %cst_31 [0] : vector<16x128xf32> to vector<128xf32>
    %78 = vector.shape_cast %77 : vector<128xf32> to vector<1x128xf32>
    %79 = vector.broadcast %7 : f32 to vector<1x128xf32>
    %80 = arith.mulf %75, %79 : vector<1x128xf32>
    %81 = vector.broadcast %7 : f32 to vector<1x128xf32>
    %82 = arith.mulf %78, %81 : vector<1x128xf32>
    %83 = arith.mulf %80, %80 : vector<1x128xf32>
    %84 = arith.subf %82, %83 : vector<1x128xf32>
    %cst_32 = arith.constant 0.000000e+00 : f32
    %85 = vector.broadcast %cst_32 : f32 to vector<1x128xf32>
    %86 = arith.maximumf %84, %85 : vector<1x128xf32>
    %87 = vector.broadcast %80 : vector<1x128xf32> to vector<16x128xf32>
    %88 = arith.subf %71, %87 : vector<16x128xf32>
    %cst_33 = arith.constant 9.99999974E-6 : f32
    %89 = vector.broadcast %cst_33 : f32 to vector<1x128xf32>
    %90 = arith.addf %86, %89 : vector<1x128xf32>
    %91 = math.rsqrt %90 : vector<1x128xf32>
    %92 = vector.broadcast %91 : vector<1x128xf32> to vector<16x128xf32>
    %93 = arith.mulf %88, %92 : vector<16x128xf32>
    %cst_34 = arith.constant 0.000000e+00 : f32
    %94 = vector.broadcast %cst_34 : f32 to vector<16x128xf32>
    %95 = arith.maximumf %93, %94 : vector<16x128xf32>
    %96 = vector.broadcast %17 : vector<16x1xf32> to vector<16x128xf32>
    %97 = arith.mulf %95, %96 : vector<16x128xf32>
    %c0_35 = arith.constant 0 : index
    %c0_36 = arith.constant 0 : index
    %98 = vector.load %arg20[%c0_35, %c0_36] : memref<8x16xbf16, #tpu.memory_space<vmem>>, vector<8x16xbf16>
    %99 = arith.truncf %97 : vector<16x128xf32> to vector<16x128xbf16>
    %cst_37 = arith.constant dense<0.000000e+00> : vector<8x128xf32>
    %100 = tpu.matmul %98, %99, %cst_37 {dimension_numbers = #tpu.dot_dimension_numbers<[1], [0], [0], [1], [0, 0, 1, 1], [], []>} : vector<8x16xbf16>, vector<16x128xbf16>, vector<8x128xf32> -> vector<8x128xf32>
    %101 = arith.truncf %100 : vector<8x128xf32> to vector<8x128xbf16>
    %102 = tpu.concatenate %22, %101 in 1 : vector<8x128xbf16>, vector<8x128xbf16> -> vector<8x256xbf16>
    %c0_38 = arith.constant 0 : index
    %c0_39 = arith.constant 0 : index
    %c0_40 = arith.constant 0 : index
    %103 = vector.load %arg12[%c0_38, %c0_39, %c0_40] : memref<1x256x128xbf16, #tpu.memory_space<vmem>>, vector<1x256x128xbf16>
    %104 = vector.shape_cast %103 : vector<1x256x128xbf16> to vector<256x128xbf16>
    %cst_41 = arith.constant dense<0.000000e+00> : vector<8x128xf32>
    %105 = tpu.matmul %102, %104, %cst_41 {dimension_numbers = #tpu.dot_dimension_numbers<[1], [0], [0], [1], [0, 0, 1, 1], [], []>} : vector<8x256xbf16>, vector<256x128xbf16>, vector<8x128xf32> -> vector<8x128xf32>
    %106 = vector.broadcast %12 : vector<8x1xf32> to vector<8x128xf32>
    %107 = arith.mulf %105, %106 : vector<8x128xf32>
    %cst_42 = arith.constant dense<0.000000e+00> : vector<128xf32>
    %108 = vector.multi_reduction <add>, %107, %cst_42 [0] : vector<8x128xf32> to vector<128xf32>
    %109 = vector.shape_cast %108 : vector<128xf32> to vector<1x128xf32>
    %110 = arith.mulf %107, %107 : vector<8x128xf32>
    %cst_43 = arith.constant dense<0.000000e+00> : vector<128xf32>
    %111 = vector.multi_reduction <add>, %110, %cst_43 [0] : vector<8x128xf32> to vector<128xf32>
    %112 = vector.shape_cast %111 : vector<128xf32> to vector<1x128xf32>
    %113 = vector.broadcast %4 : f32 to vector<1x128xf32>
    %114 = arith.mulf %109, %113 : vector<1x128xf32>
    %115 = vector.broadcast %4 : f32 to vector<1x128xf32>
    %116 = arith.mulf %112, %115 : vector<1x128xf32>
    %117 = arith.mulf %114, %114 : vector<1x128xf32>
    %118 = arith.subf %116, %117 : vector<1x128xf32>
    %cst_44 = arith.constant 0.000000e+00 : f32
    %119 = vector.broadcast %cst_44 : f32 to vector<1x128xf32>
    %120 = arith.maximumf %118, %119 : vector<1x128xf32>
    %121 = vector.broadcast %114 : vector<1x128xf32> to vector<8x128xf32>
    %122 = arith.subf %105, %121 : vector<8x128xf32>
    %cst_45 = arith.constant 9.99999974E-6 : f32
    %123 = vector.broadcast %cst_45 : f32 to vector<1x128xf32>
    %124 = arith.addf %120, %123 : vector<1x128xf32>
    %125 = math.rsqrt %124 : vector<1x128xf32>
    %126 = vector.broadcast %125 : vector<1x128xf32> to vector<8x128xf32>
    %127 = arith.mulf %122, %126 : vector<8x128xf32>
    %cst_46 = arith.constant 0.000000e+00 : f32
    %128 = vector.broadcast %cst_46 : f32 to vector<8x128xf32>
    %129 = arith.maximumf %127, %128 : vector<8x128xf32>
    %130 = vector.broadcast %12 : vector<8x1xf32> to vector<8x128xf32>
    %131 = arith.mulf %129, %130 : vector<8x128xf32>
    %132 = arith.truncf %131 : vector<8x128xf32> to vector<8x128xbf16>
    %c0_47 = arith.constant 0 : index
    %c0_48 = arith.constant 0 : index
    %c0_49 = arith.constant 0 : index
    %133 = vector.load %arg13[%c0_47, %c0_48, %c0_49] : memref<1x128x128xbf16, #tpu.memory_space<vmem>>, vector<1x128x128xbf16>
    %134 = vector.shape_cast %133 : vector<1x128x128xbf16> to vector<128x128xbf16>
    %cst_50 = arith.constant dense<0.000000e+00> : vector<8x128xf32>
    %135 = tpu.matmul %132, %134, %cst_50 {dimension_numbers = #tpu.dot_dimension_numbers<[1], [0], [0], [1], [0, 0, 1, 1], [], []>} : vector<8x128xbf16>, vector<128x128xbf16>, vector<8x128xf32> -> vector<8x128xf32>
    %136 = vector.broadcast %12 : vector<8x1xf32> to vector<8x128xf32>
    %137 = arith.mulf %135, %136 : vector<8x128xf32>
    %cst_51 = arith.constant dense<0.000000e+00> : vector<128xf32>
    %138 = vector.multi_reduction <add>, %137, %cst_51 [0] : vector<8x128xf32> to vector<128xf32>
    %139 = vector.shape_cast %138 : vector<128xf32> to vector<1x128xf32>
    %140 = arith.mulf %137, %137 : vector<8x128xf32>
    %cst_52 = arith.constant dense<0.000000e+00> : vector<128xf32>
    %141 = vector.multi_reduction <add>, %140, %cst_52 [0] : vector<8x128xf32> to vector<128xf32>
    %142 = vector.shape_cast %141 : vector<128xf32> to vector<1x128xf32>
    %143 = vector.broadcast %4 : f32 to vector<1x128xf32>
    %144 = arith.mulf %139, %143 : vector<1x128xf32>
    %145 = vector.broadcast %4 : f32 to vector<1x128xf32>
    %146 = arith.mulf %142, %145 : vector<1x128xf32>
    %147 = arith.mulf %144, %144 : vector<1x128xf32>
    %148 = arith.subf %146, %147 : vector<1x128xf32>
    %cst_53 = arith.constant 0.000000e+00 : f32
    %149 = vector.broadcast %cst_53 : f32 to vector<1x128xf32>
    %150 = arith.maximumf %148, %149 : vector<1x128xf32>
    %151 = vector.broadcast %144 : vector<1x128xf32> to vector<8x128xf32>
    %152 = arith.subf %135, %151 : vector<8x128xf32>
    %cst_54 = arith.constant 9.99999974E-6 : f32
    %153 = vector.broadcast %cst_54 : f32 to vector<1x128xf32>
    %154 = arith.addf %150, %153 : vector<1x128xf32>
    %155 = math.rsqrt %154 : vector<1x128xf32>
    %156 = vector.broadcast %155 : vector<1x128xf32> to vector<8x128xf32>
    %157 = arith.mulf %152, %156 : vector<8x128xf32>
    %cst_55 = arith.constant 0.000000e+00 : f32
    %158 = vector.broadcast %cst_55 : f32 to vector<8x128xf32>
    %159 = arith.maximumf %157, %158 : vector<8x128xf32>
    %160 = vector.broadcast %12 : vector<8x1xf32> to vector<8x128xf32>
    %161 = arith.mulf %159, %160 : vector<8x128xf32>
    %162 = arith.addf %21, %161 : vector<8x128xf32>
    %c0_56 = arith.constant 0 : index
    %c0_57 = arith.constant 0 : index
    %163 = vector.load %arg17[%c0_56, %c0_57] : memref<8x128xf32, #tpu.memory_space<vmem>>, vector<8x128xf32>
    tpu.vector_store %arg17[%c0_56, %c0_57], %162 {strides = array<i32>} : memref<8x128xf32, #tpu.memory_space<vmem>>, vector<8x128xf32>,
    %c3_i32 = arith.constant 3 : i32
    %164 = arith.cmpi eq, %arg0, %c3_i32 : i32
    %165 = arith.extui %164 : i1 to i32
    %c0_i32_58 = arith.constant 0 : i32
    %166 = arith.cmpi ne, %165, %c0_i32_58 : i32
    scf.if %166 {
      %167 = arith.truncf %162 : vector<8x128xf32> to vector<8x128xbf16>
      %c0_59 = arith.constant 0 : index
      %c0_60 = arith.constant 0 : index
      %168 = vector.load %arg14[%c0_59, %c0_60] : memref<128x128xf32, #tpu.memory_space<vmem>>, vector<128x128xf32>
      %169 = arith.truncf %168 : vector<128x128xf32> to vector<128x128xbf16>
      %cst_61 = arith.constant dense<0.000000e+00> : vector<8x128xf32>
      %170 = tpu.matmul %167, %169, %cst_61 {dimension_numbers = #tpu.dot_dimension_numbers<[1], [0], [0], [1], [0, 0, 1, 1], [], []>} : vector<8x128xbf16>, vector<128x128xbf16>, vector<8x128xf32> -> vector<8x128xf32>
      %c0_62 = arith.constant 0 : index
      %c0_63 = arith.constant 0 : index
      %171 = vector.load %arg15[%c0_62, %c0_63] : memref<1x128xf32, #tpu.memory_space<vmem>>, vector<1x128xf32>
      %172 = vector.broadcast %171 : vector<1x128xf32> to vector<8x128xf32>
      %173 = arith.addf %170, %172 : vector<8x128xf32>
      %c0_64 = arith.constant 0 : index
      %c0_65 = arith.constant 0 : index
      %174 = vector.load %arg16[%c0_64, %c0_65] : memref<8x128xf32, #tpu.memory_space<vmem>>, vector<8x128xf32>
      tpu.vector_store %arg16[%c0_64, %c0_65], %173 {strides = array<i32>} : memref<8x128xf32, #tpu.memory_space<vmem>>, vector<8x128xf32>,
    } else {
    }
    return
  }
  func.func @transform_0(%arg0: i32) -> i32 {
    %c0_i32 = arith.constant 0 : i32
    %c0_i32_0 = arith.constant 0 : i32
    return %c0_i32 : i32
  }
  func.func @transform_1(%arg0: i32) -> (i32, i32) {
    %c0_i32 = arith.constant 0 : i32
    %c0_i32_0 = arith.constant 0 : i32
    %c0_i32_1 = arith.constant 0 : i32
    return %c0_i32, %c0_i32_0 : i32, i32
  }
  func.func @transform_2(%arg0: i32) -> (i32, i32) {
    %c0_i32 = arith.constant 0 : i32
    %c0_i32_0 = arith.constant 0 : i32
    %c0_i32_1 = arith.constant 0 : i32
    return %c0_i32, %c0_i32_0 : i32, i32
  }
  func.func @transform_3(%arg0: i32) -> (i32, i32) {
    %c0_i32 = arith.constant 0 : i32
    %c0_i32_0 = arith.constant 0 : i32
    %c0_i32_1 = arith.constant 0 : i32
    return %c0_i32, %c0_i32_0 : i32, i32
  }
  func.func @transform_4(%arg0: i32) -> (i32, i32) {
    %c0_i32 = arith.constant 0 : i32
    %c0_i32_0 = arith.constant 0 : i32
    %c0_i32_1 = arith.constant 0 : i32
    return %c0_i32, %c0_i32_0 : i32, i32
  }
  func.func @transform_5(%arg0: i32) -> (i32, i32) {
    %c0_i32 = arith.constant 0 : i32
    %c0_i32_0 = arith.constant 0 : i32
    %c0_i32_1 = arith.constant 0 : i32
    return %c0_i32, %c0_i32_0 : i32, i32
  }
  func.func @transform_6(%arg0: i32) -> (i32, i32) {
    %c0_i32 = arith.constant 0 : i32
    %c0_i32_0 = arith.constant 0 : i32
    %c0_i32_1 = arith.constant 0 : i32
    return %c0_i32, %c0_i32_0 : i32, i32
  }
  func.func @transform_7(%arg0: i32) -> (i32, i32) {
    %c0_i32 = arith.constant 0 : i32
    %c0_i32_0 = arith.constant 0 : i32
    %c0_i32_1 = arith.constant 0 : i32
    return %c0_i32, %c0_i32_0 : i32, i32
  }
  func.func @transform_8(%arg0: i32) -> (i32, i32, i32) {
    %c0_i32 = arith.constant 0 : i32
    %c0_i32_0 = arith.constant 0 : i32
    %c0_i32_1 = arith.constant 0 : i32
    return %arg0, %c0_i32, %c0_i32_0 : i32, i32, i32
  }
  func.func @transform_9(%arg0: i32) -> (i32, i32, i32) {
    %c0_i32 = arith.constant 0 : i32
    %c0_i32_0 = arith.constant 0 : i32
    %c0_i32_1 = arith.constant 0 : i32
    return %arg0, %c0_i32, %c0_i32_0 : i32, i32, i32
  }
  func.func @transform_10(%arg0: i32) -> (i32, i32, i32) {
    %c0_i32 = arith.constant 0 : i32
    %c0_i32_0 = arith.constant 0 : i32
    %c0_i32_1 = arith.constant 0 : i32
    return %arg0, %c0_i32, %c0_i32_0 : i32, i32, i32
  }
  func.func @transform_11(%arg0: i32) -> (i32, i32, i32) {
    %c0_i32 = arith.constant 0 : i32
    %c0_i32_0 = arith.constant 0 : i32
    %c0_i32_1 = arith.constant 0 : i32
    return %arg0, %c0_i32, %c0_i32_0 : i32, i32, i32
  }
  func.func @transform_12(%arg0: i32) -> (i32, i32, i32) {
    %c0_i32 = arith.constant 0 : i32
    %c0_i32_0 = arith.constant 0 : i32
    %c0_i32_1 = arith.constant 0 : i32
    return %arg0, %c0_i32, %c0_i32_0 : i32, i32, i32
  }
  func.func @transform_13(%arg0: i32) -> (i32, i32) {
    %c0_i32 = arith.constant 0 : i32
    %c0_i32_0 = arith.constant 0 : i32
    %c0_i32_1 = arith.constant 0 : i32
    return %c0_i32, %c0_i32_0 : i32, i32
  }
  func.func @transform_14(%arg0: i32) -> (i32, i32) {
    %c0_i32 = arith.constant 0 : i32
    %c0_i32_0 = arith.constant 0 : i32
    %c0_i32_1 = arith.constant 0 : i32
    return %c0_i32, %c0_i32_0 : i32, i32
  }
  func.func @transform_15(%arg0: i32) -> (i32, i32) {
    %c0_i32 = arith.constant 0 : i32
    %c0_i32_0 = arith.constant 0 : i32
    %c0_i32_1 = arith.constant 0 : i32
    return %c0_i32, %c0_i32_0 : i32, i32
  }
}

</mosaic_0001>

<bundles_post_ra>
// kernel: mpnn_model_forward.1
= control target key start
LH: loop header
LB: loop body
LE: loop exit
PB: predicated region body
PF: predicated region fallthrough
CT: control target
= control target key end

     0   :  { %s2807_s0 = inlined_call_operand.vmem [shape: s32[2], index: 0, kind: input, shape index: {}]   ;;  %s2808_s1 = inlined_call_operand.vmem [shape: f32[8,8], index: 1, kind: input, shape index: {}]   ;;  %s2809_s2 = inlined_call_operand.vmem [shape: f32[8,128], index: 2, kind: input, shape index: {}]   ;;  %s2810_s3 = inlined_call_operand.vmem [shape: f32[1,128], index: 3, kind: input, shape index: {}]   ;;  %s2811_s4 = inlined_call_operand.vmem [shape: s32[16,1], index: 4, kind: input, shape index: {}]   ;;  %s2812_s5 = inlined_call_operand.vmem [shape: s32[16,1], index: 5, kind: input, shape index: {}]   ;;  %s2813_s6 = inlined_call_operand.vmem [shape: s32[1,16], index: 6, kind: input, shape index: {}]   ;;  %s2814_s7 = inlined_call_operand.vmem [shape: f32[16,8], index: 7, kind: input, shape index: {}]   ;;  %s2815_s8 = inlined_call_operand.hbm [shape: bf16[4,128,256], index: 8, kind: input, shape index: {}]   ;;  %s2816_s9 = inlined_call_operand.vmem [shape: f32[4,8,128], index: 9, kind: input, shape index: {}]   ;;  %s2817_s10 = inlined_call_operand.hbm [shape: bf16[4,128,128], index: 10, kind: input, shape index: {}]   ;;  %s2818_s11 = inlined_call_operand.hbm [shape: bf16[4,256,128], index: 11, kind: input, shape index: {}]   ;;  %s2819_s12 = inlined_call_operand.hbm [shape: bf16[4,128,128], index: 12, kind: input, shape index: {}]   ;;  %s2820_s13 = inlined_call_operand.hbm [shape: f32[128,128], index: 13, kind: input, shape index: {}]   ;;  %s2821_s14 = inlined_call_operand.vmem [shape: f32[1,128], index: 14, kind: input, shape index: {}]   ;;  %s2822_s15 = inlined_call_operand.vmem [shape: f32[8,128], index: 15, kind: output, shape index: {}]  }
   0x1   :  { %2837 = sst [smem:[#allocation24_spill]] %s2807_s0 }
   0x2   :  { %2838 = sst [smem:[#allocation25_spill]] %s2808_s1 }
   0x3   :  { %2839 = sst [smem:[#allocation26_spill]] %s2809_s2 }
   0x4   :  { %2840 = sst [smem:[#allocation27_spill]] %s2810_s3 }
   0x5   :  { %2841 = sst [smem:[#allocation28_spill]] %s2811_s4 }
   0x6   :  { %2842 = sst [smem:[#allocation29_spill]] %s2812_s5 }
   0x7   :  { %2843 = sst [smem:[#allocation30_spill]] %s2813_s6 }
   0x8   :  { %2844 = sst [smem:[#allocation31_spill]] %s2814_s7 }
   0x9   :  { %2845 = sst [smem:[#allocation32_spill]] %s2817_s10 }
   0xa   :  { %2846 = sst [smem:[#allocation33_spill]] %s2820_s13 }
   0xb   :  { %2847 = sst [smem:[#allocation34_spill]] %s2821_s14 }
   0xc   :  { %2848 = sst [smem:[#allocation35_spill]] %s2822_s15 }
   0xd   :  { %20 = vsyncpa [#allocation8], 0 }
   0xe   :  { %21 = vsyncpa [#allocation7], 0 }
   0xf   :  { %23 = vsyncpa [#allocation7 + $0x1], 0 }
  0x10   :  { %24 = vsyncpa [#allocation11], 0 }
  0x11   :  { %26 = vsyncpa [#allocation11 + $0x1], 0 }
  0x12   :  { %27 = vsyncpa [#allocation14], 0 }
  0x13   :  { %29 = vsyncpa [#allocation14 + $0x1], 0  ;;  %s2402_s18 = smov 0   ;;  %s2404_s19 = smov 0  }
  0x14   :  { %s2406_s20 = smov 0   ;;  %s2408_s21 = smov 0  }
  0x15 LB: > { %2849 = sst [smem:[#allocation21_spill]] %s2307_s20  ;;  %s2421_s22 = sadd.s32 4294967295, %s2311_s21   ;;  %s2311_s21 = sphi %s2408_s21, %s2874_s21   ;;  %s2307_s20 = sphi %s2406_s20, %s2876_s20   ;;  %s2303_s19 = sphi %s2404_s19, %s2878_s19   ;;  %s2299_s18 = sphi %s2402_s18, %s2877_s18  }
  0x16   : > { %p223_p0 = scmp.ne.s32.totalorder %s2303_s19, %s2299_s18  ;;  %p224_p1 = scmp.eq.s32.totalorder %s2421_s22, 0 }
  0x17   : > { %p1697_p2 = scmp.ge.s32.totalorder %s2311_s21, 1  ;;  %p401_p3 = scmp.lt.s32.totalorder %s2311_s21, 5 }
  0x18   : > { %p1698_p4 = scmp.ne.s32.totalorder %s2421_s22, 0  ;;  %p2430_p5 = por %p224_p1, %p223_p0 }
  0x19   : > { %s2851_s13 = sld [smem:[#allocation33_spill]]  ;;  %p2437_p6 = pnand %p1697_p2, %p401_p3 }
  0x1a   : > { %s2313_s28 = smov [#allocation15]   ;;  %s2450_s16 = sadd.s32 1, %s2311_s21  }
  0x1b   : > { %p2013_p7 = pneg %p2437_p6  ;;  %s445_s29 = sshll.u32 %s2313_s28, 4  ;;  %s446_s29 = int_to_ptr.vmem [resolvable:$true] %s445_s29 }
  0x1c   : > { %2854 = sst [smem:[#allocation22_spill]] %s2450_s16  ;;  %s2824_s17 = smov 128  }
  0x1d   : > { %p2445_p8 = pnand %p2013_p7, %p224_p1  ;;  %s2825_s18 = smov 8  }
  0x1e   : > { %s207_s24 = ssub.s32 %s2311_s21, %s2450_s16  ;;  %s210_s25 = sadd.s32 1, %s2307_s20 }
  0x1f   : > { %s443_s26 = sshll.u32 %s2851_s13, 4  ;;  %p208_p9 = scmp.eq.s32.totalorder %s207_s24, 0  ;;  %s444_s26 = int_to_ptr.hbm [resolvable:$true] %s443_s26 }
  0x20   : > { %2019 = dma.hbm_to_vmem [thread:$0]  (!%p2445_p8), %s444_s26, 2048, %s446_s29, [#allocation14], %s2824_s17, %s2824_s17, %s2825_s18  }
  0x21   : > { %p217_p10 = scmp.ne.s32.totalorder %s2307_s20, %s2303_s19  ;;  %p218_p11 = scmp.eq.s32.totalorder %s2311_s21, 0 }
  0x22   : > { %p2035_p12 = scmp.lt.s32.totalorder %s2311_s21, 4  ;;  %s2468_s13 = sand.u32 1, %s2307_s20  }
  0x23   : > { %s2465_s28 = scalar_select %p208_p9, %s2307_s20, %s210_s25  }
  0x24   : > { %p219_p13 = por %p218_p11, %p217_p10  ;;  %s2830_s15 = sand.u32 1, %s2311_s21  }
  0x25   : > { %2855 = sst [smem:[#allocation23_spill]] %s2465_s28  ;;  %s2829_s14 = sshll.u32 %s2468_s13, 6 }
  0x26   : > { %p2472_p0 = pnand %p2035_p12, %p219_p13  ;;  %s1940_s26 = sshll.u32 %s2311_s21, 6 }
  0x27   : > { %s2857_s10 = sld [smem:[#allocation32_spill]]  ;;  %s495_s18 = scalar_lea.vmem [#allocation10], %s2829_s14 }
  0x28   : > { %s503_s28 = sshll.u32 %s495_s18, 4  ;;  %s2484_s20 = scalar_lea.sflag [#allocation11], %s2830_s15  ;;  %s504_s28 = int_to_ptr.vmem [resolvable:$true] %s503_s28 }
  0x29   : > { %p2130_p3 = pneg %p2472_p0 }
  0x2d   : > { %s500_s17 = scalar_lea.hbm %s2857_s10, %s1940_s26  ;;  %s2133_s24 = scalar_lea.hbm %s2857_s10, 256 }
  0x2e   : > { %s501_s25 = sshll.u32 %s500_s17, 4  ;;  %s502_s25 = int_to_ptr.hbm [resolvable:$true] %s501_s25 }
  0x2f   : > { %s2126_s16 = sshra.s32 %s502_s25, 4  ;;  %s2127_s16 = int_to_ptr.hbm [resolvable:$true] %s2126_s16 }
  0x30   : > { %s2128_s3 = scalar_lea.hbm %s2127_s16, 64  ;;  %p2134_p10 = scmp.lt.s32.totalorder %s2127_s16, %s2857_s10 }
  0x31   : > { %p2129_p2 = scmp.ne.s32.totalorder %s2127_s16, %s2128_s3  ;;  %p2135_p11 = scmp.lt.s32.totalorder %s2133_s24, %s2128_s3 }
  0x33   : > { %p2131_p7 = pnand %p2130_p3, %p2129_p2  ;;  %p2136_p12 = por %p2135_p11, %p2134_p10 }
  0x35   : > { %p2132_p9 = pneg %p2131_p7 }
  0x37   : > { %p2137_p13 = pnand %p2136_p12, %p2132_p9 }
  0x39   : > { %2140 = shalt.err (!%p2137_p13)
}
  0x3a   : > { %s2831_s15 = smov 64   ;;  %s2833_s6 = smov 4  }
  0x3b   : > { %2026 = dma.hbm_to_vmem [thread:$0]  (!%p2472_p0), %s502_s25, 1024, %s504_s28, %s2484_s20, %s2831_s15, %s2831_s15, %s2833_s6  }
  0x3c   : > { %s544_s3 = scalar_lea.hbm %s2819_s12, %s1940_s26  ;;  %s2858_s16 = sshll.u32 %s2468_s13, 6 }
  0x3d   : > { %s539_s17 = scalar_lea.vmem [#allocation13], %s2858_s16  ;;  %s545_s18 = sshll.u32 %s544_s3, 4  ;;  %s2510_s18 = int_to_ptr.hbm [resolvable:$true] %s545_s18 }
  0x3e   : > { %s547_s24 = sshll.u32 %s539_s17, 4  ;;  %s2859_s0 = sld [smem:[#allocation24_spill]]  ;;  %s2508_s24 = int_to_ptr.vmem [resolvable:$true] %s547_s24 }
  0x3f   : > { %s2318_s28 = smov [#allocation6]   ;;  %s1701_s25 = sshll.u32 %s2468_s13, 7 }
  0x40   : > { %s1939_s26 = sshll.u32 %s2311_s21, 7  ;;  %s466_s3 = scalar_lea.vmem [#allocation9], %s1701_s25 }
  0x41   : > { %s471_s16 = scalar_lea.hbm %s2815_s8, %s1939_s26  ;;  %s474_s17 = sshll.u32 %s466_s3, 4  ;;  %s475_s17 = int_to_ptr.vmem [resolvable:$true] %s474_s17 }
  0x42   : > { %s472_s15 = sshll.u32 %s471_s16, 4  ;;  %s463_s6 = scalar_lea.sflag [#allocation7], %s2468_s13  ;;  %s473_s15 = int_to_ptr.hbm [resolvable:$true] %s472_s15 }
  0x43   : > { %s2171_s4 = sshra.s32 %s473_s15, 4  ;;  %s2178_s30 = scalar_lea.hbm %s2815_s8, 512  ;;  %s2172_s4 = int_to_ptr.hbm [resolvable:$true] %s2171_s4 }
  0x44   : > { %s413_s2 = sshll.u32 %s2859_s0, 4  ;;  %s2173_s1 = scalar_lea.hbm %s2172_s4, 128  ;;  %s414_s2 = int_to_ptr.vmem [resolvable:$true] %s413_s2 }
  0x45   : > { %2016 = dma.vmem_to_smem (!%p2445_p8), %s414_s2, 16, %s2318_s28, [#allocation8]  }
  0x46   : > { %p2174_p2 = scmp.ne.s32.totalorder %s2172_s4, %s2173_s1  ;;  %p2179_p9 = scmp.lt.s32.totalorder %s2172_s4, %s2815_s8 }
  0x47   : > { %p2180_p10 = scmp.lt.s32.totalorder %s2178_s30, %s2173_s1 }
  0x48   : > { %p2176_p7 = pnand %p2174_p2, %p2130_p3 }
  0x49   : > { %p2181_p11 = por %p2180_p10, %p2179_p9 }
  0x4a   : > { %p2177_p8 = pneg %p2176_p7 }
  0x4c   : > { %p2182_p12 = pnand %p2181_p11, %p2177_p8 }
  0x4e   : > { %2185 = shalt.err (!%p2182_p12)
}
  0x4f   : > { %s2860_s13 = smov 8   ;;  %s2861_s14 = smov 128  }
  0x50   : > { %2023 = dma.hbm_to_vmem [thread:$0]  (!%p2472_p0), %s473_s15, 2048, %s475_s17, %s463_s6, %s2861_s14, %s2861_s14, %s2860_s13  }
  0x51   : > { %s522_s2 = scalar_lea.hbm %s2818_s11, %s1939_s26  ;;  %s517_s10 = scalar_lea.vmem [#allocation12], %s1701_s25 }
  0x52   : > { %s525_s0 = sshll.u32 %s517_s10, 4  ;;  %s523_s5 = sshll.u32 %s522_s2, 4  ;;  %s526_s0 = int_to_ptr.vmem [resolvable:$true] %s525_s0  ;;  %s524_s5 = int_to_ptr.hbm [resolvable:$true] %s523_s5 }
  0x53   : > { %s2201_s4 = sshra.s32 %s524_s5, 4  ;;  %s2208_s6 = scalar_lea.hbm %s2818_s11, 512  ;;  %s2202_s4 = int_to_ptr.hbm [resolvable:$true] %s2201_s4 }
  0x54   : > { %s2203_s1 = scalar_lea.hbm %s2202_s4, 128  ;;  %p2209_p8 = scmp.lt.s32.totalorder %s2202_s4, %s2818_s11 }
  0x55   : > { %p2204_p13 = scmp.ne.s32.totalorder %s2202_s4, %s2203_s1  ;;  %p2210_p9 = scmp.lt.s32.totalorder %s2208_s6, %s2203_s1 }
  0x57   : > { %p2206_p2 = pnand %p2204_p13, %p2130_p3  ;;  %p2211_p10 = por %p2210_p9, %p2209_p8 }
  0x59   : > { %p2207_p7 = pneg %p2206_p2 }
  0x5b   : > { %p2212_p11 = pnand %p2211_p10, %p2207_p7 }
  0x5d   : > { %2215 = shalt.err (!%p2212_p11)
}
  0x5e   : > { %s2862_s25 = smov 4   ;;  %s2863_s26 = smov 64  }
  0x5f   : > { %2029 = dma.hbm_to_vmem [thread:$0]  (!%p2472_p0), %s524_s5, 2048, %s526_s0, %s2484_s20, %s2863_s26, %s2863_s26, %s2862_s25  }
  0x60   : > { %s2864_s29 = sand.u32 1, %s2311_s21   ;;  %s2231_s14 = sshra.s32 %s2510_s18, 4  ;;  %s2232_s14 = int_to_ptr.hbm [resolvable:$true] %s2231_s14 }
  0x61   : > { %s536_s13 = scalar_lea.sflag [#allocation14], %s2864_s29  ;;  %s2233_s16 = scalar_lea.hbm %s2232_s14, 64 }
  0x62   : > { %p2234_p12 = scmp.ne.s32.totalorder %s2232_s14, %s2233_s16  ;;  %s2238_s10 = scalar_lea.hbm %s2819_s12, 256 }
  0x63   : > { %p2239_p7 = scmp.lt.s32.totalorder %s2232_s14, %s2819_s12  ;;  %p2240_p8 = scmp.lt.s32.totalorder %s2238_s10, %s2233_s16 }
  0x64   : > { %p2236_p13 = pnand %p2234_p12, %p2130_p3 }
  0x65   : > { %p2241_p9 = por %p2240_p8, %p2239_p7 }
  0x66   : > { %p2237_p2 = pneg %p2236_p13 }
  0x68   : > { %p2242_p10 = pnand %p2241_p9, %p2237_p2 }
  0x6a   : > { %2245 = shalt.err (!%p2242_p10)
}
  0x6b   : > { %2032 = dma.hbm_to_vmem [thread:$0]  (!%p2472_p0), %s2510_s18, 1024, %s2508_s24, %s536_s13, %s2863_s26, %s2863_s26, %s2862_s25  }
  0x6c   : > { %559 = sbr.rel (%p2437_p6) target bundleno = 1587 (0x633), region = 80 }
  0x71   : > { %2278 = dma.done.wait (%p224_p1), [#allocation8], 16  }
  0x72   : > { %2280 = vsyncadd (%p224_p1), [#allocation8], 4294967280  ;;  %s566_s0 = sand.u32 1, %s2303_s19  }
  0x73   : > { %s1715_s5 = sshll.u32 %s566_s0, 7  ;;  %s567_s7 = scalar_lea.sflag [#allocation7], %s566_s0 }
  0x74   : > { %s2581_s20 = scalar_lea.vmem [#allocation9], %s1715_s5 }
  0x75   : > { %2282 = dma.done.wait (%p2430_p5), %s567_s7, 2048  }
  0x76   : > { %2284 = vsyncadd (%p2430_p5), %s567_s7, 4294965248  ;;  %s576_s21 = sand.u32 1, %s2421_s22   ;;  %s1716_s27 = sshll.u32 %s566_s0, 6 }
  0x77   : > { %s577_s24 = scalar_lea.sflag [#allocation11], %s576_s21  ;;  %s2588_s18 = scalar_lea.vmem [#allocation10], %s1716_s27 }
  0x78   : > { %2286 = dma.done.wait (%p2430_p5), %s577_s24, 3072  }
  0x79   : > { %2288 = vsyncadd (%p2430_p5), %s577_s24, 4294964224  ;;  %s2594_s30 = scalar_lea.vmem [#allocation12], %s1715_s5  ;;  %s597_s28 = scalar_lea.sflag [#allocation14], %s576_s21 }
  0x7a   : > { %s2596_s6 = scalar_lea.vmem [#allocation13], %s1716_s27 }
  0x7b   : > { %2290 = dma.done.wait (%p2430_p5), %s597_s28, 1024  }
  0x7c   : > { %2292 = vsyncadd (%p2430_p5), %s597_s28, 4294966272 }
  0x7d   : > { %2294 = dma.done.wait (%p224_p1), [#allocation14], 2048  }
  0x7e   : > { %2296 = vsyncadd (%p224_p1), [#allocation14], 4294965248 }
  0x7f   : > { %611 = sfence }
  0x80   : > { %p668_p6 = scmp.lt.s32.totalorder %s2421_s22, 3  ;;  %s673_s15 = sld [smem:[#allocation6]]  ;;  %v713_v0 = vlaneseq  ;;  %v2319_v5 = vmov 0.0  }
  0x81   : > { %s1721_s17 = sld [smem:[#allocation6 + $0x1]] }
  0x82   : > { %s669_s25 = scalar_select %p668_p6, %s2421_s22, 3  ;;  %v2609_v1 = vshrl.u32 %v713_v0, 7 }
  0x83   : > { %s2865_s1 = sld [smem:[#allocation29_spill]] (!%p1698_p4) }
  0x84   : > { %s1720_s26 = sshll.u32 %s669_s25, 3  ;;  %v2612_v2 = vadd.s32 8, %v2609_v1  ;;  %s2866_s7 = sld [smem:[#allocation28_spill]] (!%p1698_p4) }
  0x85   : > { %s2617_s13 = scalar_lea.vmem %s2816_s9, %s1720_s26  ;;  %s2867_s24 = sld [smem:[#allocation26_spill]] (!%p1698_p4) }
  0x86   : > { %p675_p1 = scmp.gt.s32.totalorder %s673_s15, 1  ;;  %v715_v3 = vstv %s673_s15  ;;  %s2869_s10 = sld [smem:[#allocation30_spill]] (!%p1698_p4) }
  0x87   : > { %vm716_vm0 = vcmp.lt.s32.totalorder %v2609_v1, %v715_v3  ;;  %p694_p5 = scmp.gt.s32.totalorder %s1721_s17, 1  ;;  %v2620_v4 = vstv %s1721_s17  ;;  %s2870_s5 = sld [smem:[#allocation27_spill]] (!%p1698_p4) }
  0x88   : > { %s2880_s15 = smov (!%p675_p1, %s673_s15), 1  ;;  %v2622_v6 = vsel %vm716_vm0, 1.0, %v2319_v5  ;;  %vm721_vm1 = vcmp.lt.s32.totalorder %v2609_v1, %v2620_v4  ;;  %vm722_vm2 = vcmp.lt.s32.totalorder %v2612_v2, %v2620_v4 }
  0x89   : > { %s2882_s17 = smov (!%p694_p5, %s1721_s17), 1  ;;  %v2631_v7 = vsel %vm721_vm1, 1.0, %v2319_v5  ;;  %v2636_v8 = vsel %vm722_vm2, 1.0, %v2319_v5  ;;  %s677_s14 = scvt.s32.f32 %s2880_s15 }
  0x8a   : > { %s696_s16 = scvt.s32.f32 %s2882_s17  ;;  %s2868_s17 = sld [smem:[#allocation25_spill]] (!%p1698_p4) }
  0x8b   : > { %v678_v9 = vstv %s677_s14 }
  0x8c   : > { %2079 = vrcp.f32 %v678_v9  ;;  %v697_v10 = vstv %s696_s16  ;;  %vm684_vm3 = vweird.f32 %v678_v9  ;;  %v690_v14 = vand.u32 2147483648, %v678_v9 }
  0x8d   : > { %2081 = vrcp.f32 %v697_v10  ;;  %v688_v16 = vand.u32 2147483647, %v678_v9  ;;  %vm703_vm5 = vweird.f32 %v697_v10  ;;  %v709_v18 = vand.u32 2147483648, %v697_v10 }
  0x8e   : > { %v707_v21 = vand.u32 2147483647, %v697_v10  ;;  %v691_v22 = vor.u32 1.1754944e-38, %v690_v14 }
  0x8f   : > { %vm689_vm8 = vcmp.eq.f32.partialorder %v688_v16, 8.507059e+37  ;;  %v710_v25 = vor.u32 1.1754944e-38, %v709_v18 }
  0x90   : > { %vm708_vm10 = vcmp.eq.f32.partialorder %v707_v21, 8.507059e+37 }
  0x92   : > { %v2080_v11 = vpop.eup %2079 }
  0x93   : > { %v680_v12 = vmul.f32 %v2080_v11, %v678_v9  ;;  %v2082_v13 = vpop.eup %2081  ;;  %vm685_vm4 = vweird.f32 %v2080_v11 }
  0x94   : > { %v699_v17 = vmul.f32 %v2082_v13, %v697_v10  ;;  %vm704_vm6 = vweird.f32 %v2082_v13  ;;  %vm686_vm7 = vmor %vm684_vm3, %vm685_vm4 }
  0x95   : > { %v681_v15 = vsub.f32 1.0, %v680_v12  ;;  %vm705_vm9 = vmor %vm703_vm5, %vm704_vm6 }
  0x96   : > { %v700_v20 = vsub.f32 1.0, %v699_v17 }
  0x97   : > { %v682_v19 = vmul.f32 %v2080_v11, %v681_v15 }
  0x98   : > { %v701_v24 = vmul.f32 %v2082_v13, %v700_v20 }
  0x99   : > { %v683_v23 = vadd.f32 %v2080_v11, %v682_v19 }
  0x9a   : > { %v702_v27 = vadd.f32 %v2082_v13, %v701_v24 }
  0x9b   : > { %v687_v26 = vsel %vm686_vm7, %v2080_v11, %v683_v23 }
  0x9c   : > { %v692_v28 = vsel %vm689_vm8, %v691_v22, %v687_v26  ;;  %v706_v29 = vsel %vm705_vm9, %v2082_v13, %v702_v27 }
  0x9d   : > { %1993 = vpush %v692_v28  ;;  %v711_v30 = vsel %vm708_vm10, %v710_v25, %v706_v29 }
  0x9e   : > { %1995 = vpush %v711_v30 }
  0xcb   : > { %730 = sbr.rel (%p1698_p4) target bundleno = 351 (0x15f), region = 108 }
  0xce   : > { %s2638_s3 = spop %1993 }
  0xcf   : > { %s2640_s2 = spop %1995 }
  0xd0   : > { %v785_v31 = vld [vmem:[%s2865_s1] sm:$0xff]  ;;  %vm743_vm11 = vcmask 1043456   ;;  %v2320_v34 = vmov 0   ;;  %vm739_vm12 = vcmask 64512   ;;  %v786_v39 = vld [vmem:[%s2865_s1 + $0x8] sm:$0xff]  ;;  %v763_v42 = vand.u32 127, %v713_v0 }
  0xd1   : > { %v764_v32 = vld [vmem:[%s2866_s7] sm:$0xff]  ;;  %2084 = vset.pattern.permute.xlu1 %v2320_v34  ;;  %2083 = vset.pattern.permute.xlu0 %v2320_v34  ;;  %v765_v40 = vld [vmem:[%s2866_s7 + $0x8] sm:$0xff]  ;;  %vm813_vm0 = vcmask 125952   ;;  %v2321_v43 = vmov 0.0   ;;  %vm782_vm6 = vcmask 60416  }
  0xd2   : > { %v733_v33 = vld [vmem:[%s2867_s24] sm:$0xff]  ;;  %788 = vperm.xlu1 %2084, %v785_v31   ;;  %767 = vperm.xlu0 %2083, %v764_v32   ;;  %vm808_vm14 = vcmp.lt.s32.totalorder %v763_v42, %v2620_v4 }
  0xd3   : > { %v734_v35 = vpack.c.bf16 %v733_v33, %v733_v33  ;;  %v731_v36 = vld [vmem:[%s2868_s17] sm:$0xff] }
  0xd4   : > { %v732_v38 = vpack.c.bf16 %v731_v36, %v731_v36  ;;  %v2085_v41 = vld [vmem:[%s2869_s10] ss:$0 sm:$0xff] }
  0xd5   : > { %v745_v37 = vsel %vm743_vm11, %v734_v35, 0  ;;  %vm807_vm13 = vcmp.eq.s32.totalorder %v2609_v1, %v2085_v41  ;;  %v2086_v58 = vld [vmem:[%s2870_s5] ss:$0 sm:$0xff] }
  0xd6   : > { %754 = vmatpush.bf16.msra.mxu0 %v745_v37  ;;  %vm809_vm15 = vmand %vm807_vm13, %vm808_vm14 }
  0xd7   : > { %v1731_v44 = vsel %vm809_vm15, 1.0, %v2321_v43 }
  0xd8   : > { %v812_v45 = vpack.c.bf16 %v1731_v44, %v1731_v44 }
  0xd9   : > { %1726 = vmatmul.msk.bf16.vlgmr.msra.gmra.mxu0 %vm739_vm12, %v732_v38 }
  0xda   : > { %791 = vperm.xlu1 %2084, %v786_v39   ;;  %770 = vperm.xlu0 %2083, %v765_v40   ;;  %814 = vst.msk [vmem:[#allocation5] sm:$0xf] %vm813_vm0, %v812_v45 }
 0x144   : > { %v789_v46 = vpop.permute.xlu1 %788  ;;  %v768_v47 = vpop.permute.xlu0 %767 }
 0x145   : > { %vm793_vm3 = vcmp.eq.s32.totalorder %v763_v42, %v789_v46  ;;  %vm772_vm4 = vcmp.eq.s32.totalorder %v763_v42, %v768_v47 }
 0x146   : > { %vm795_vm5 = vmand %vm793_vm3, %vm721_vm1 }
 0x147   : > { %v1729_v48 = vsel %vm795_vm5, 1.0, %v2321_v43  ;;  %vm774_vm7 = vmand %vm772_vm4, %vm721_vm1 }
 0x148   : > { %v801_v49 = vpack.c.bf16 %v1729_v48, %v1729_v48  ;;  %v1727_v50 = vsel %vm774_vm7, 1.0, %v2321_v43 }
 0x149   : > { %v780_v51 = vpack.c.bf16 %v1727_v50, %v1727_v50 }
 0x14a   : > { %803 = vst.msk [vmem:[#allocation4] sm:$0xf] %vm782_vm6, %v801_v49 }
 0x14b   : > { %783 = vst.msk [vmem:[#allocation3] sm:$0xf] %vm782_vm6, %v780_v51 }
 0x14c   : > { %v792_v52 = vpop.permute.xlu1 %791  ;;  %v771_v53 = vpop.permute.xlu0 %770 }
 0x14d   : > { %vm794_vm8 = vcmp.eq.s32.totalorder %v763_v42, %v792_v52  ;;  %vm773_vm9 = vcmp.eq.s32.totalorder %v763_v42, %v771_v53 }
 0x14e   : > { %vm796_vm10 = vmand %vm794_vm8, %vm722_vm2 }
 0x14f   : > { %v1730_v54 = vsel %vm796_vm10, 1.0, %v2321_v43  ;;  %vm775_vm1 = vmand %vm773_vm9, %vm722_vm2 }
 0x150   : > { %v802_v55 = vpack.c.bf16 %v1730_v54, %v1730_v54  ;;  %v1728_v56 = vsel %vm775_vm1, 1.0, %v2321_v43 }
 0x151   : > { %v781_v57 = vpack.c.bf16 %v1728_v56, %v1728_v56 }
 0x152   : > { %804 = vst.msk [vmem:[#allocation4 + $0x4] sm:$0xf] %vm782_vm6, %v802_v55 }
 0x153   : > { %784 = vst.msk [vmem:[#allocation3 + $0x4] sm:$0xf] %vm782_vm6, %v781_v57 }
 0x156   : > { %v756_v59 = vpop.f32.mrf.mxu0 }
 0x157   : > { %v757_v60 = vadd.f32 %v2086_v58, %v756_v59 }
 0x159   : > { %v760_v61 = vmul.f32 %v2622_v6, %v757_v60 }
 0x15b   : > { %761 = vst [vmem:[#allocation2] sm:$0xff] %v760_v61 }
 0x15e   : > { %v758_v62 = vpop.f32.mrf.mxu0 }
 0x15f PF: > { %v1957_v63 = vld [vmem:[%s2581_s20 + $0x74] sm:$0xf]  ;;  %v1792_v0 = vld [vmem:[%s2581_s20 + $0x78] sm:$0xf0]  ;;  %v1955_v1 = vld [vmem:[%s2581_s20 + $0x64] sm:$0xf] }
 0x160   : > { %v1795_v2 = vor.u32 %v1957_v63, %v1792_v0  ;;  %v1784_v3 = vld [vmem:[%s2581_s20 + $0x68] sm:$0xf0]  ;;  %v1790_v4 = vld [vmem:[%s2581_s20 + $0x70] sm:$0xf]  ;;  %v1958_v5 = vld [vmem:[%s2581_s20 + $0x74] sm:$0xf0] }
 0x161   : > { %v1791_v9 = vor.u32 %v1958_v5, %v1790_v4  ;;  %v1782_v10 = vld [vmem:[%s2581_s20 + $0x60] sm:$0xf]  ;;  %v1787_v11 = vor.u32 %v1955_v1, %v1784_v3  ;;  %v1956_v12 = vld [vmem:[%s2581_s20 + $0x64] sm:$0xf0]  ;;  %v1953_v13 = vld [vmem:[%s2581_s20 + $0x54] sm:$0xf] }
 0x162   : > { %926 = vmatpush.bf16.msra.mxu1 %v1795_v2  ;;  %v1776_v14 = vld [vmem:[%s2581_s20 + $0x58] sm:$0xf0]  ;;  %v1783_v15 = vor.u32 %v1956_v12, %v1782_v10  ;;  %v1774_v16 = vld [vmem:[%s2581_s20 + $0x50] sm:$0xf]  ;;  %v1954_v17 = vld [vmem:[%s2581_s20 + $0x54] sm:$0xf0] }
 0x163   : > { %913 = vmatpush.bf16.msra.mxu0 %v1791_v9  ;;  %v1779_v18 = vor.u32 %v1953_v13, %v1776_v14  ;;  %v1951_v19 = vld [vmem:[%s2581_s20 + $0x44] sm:$0xf]  ;;  %v1768_v20 = vld [vmem:[%s2581_s20 + $0x48] sm:$0xf0]  ;;  %v1775_v21 = vor.u32 %v1954_v17, %v1774_v16  ;;  %v1766_v22 = vld [vmem:[%s2581_s20 + $0x40] sm:$0xf] }
 0x164   : > { %v1952_v23 = vld [vmem:[%s2581_s20 + $0x44] sm:$0xf0]  ;;  %v1771_v24 = vor.u32 %v1951_v19, %v1768_v20  ;;  %v1949_v25 = vld [vmem:[%s2581_s20 + $0x34] sm:$0xf]  ;;  %v1760_v26 = vld [vmem:[%s2581_s20 + $0x38] sm:$0xf0] }
 0x165   : > { %v1767_v27 = vor.u32 %v1952_v23, %v1766_v22  ;;  %v1758_v28 = vld [vmem:[%s2581_s20 + $0x30] sm:$0xf]  ;;  %v1950_v29 = vld [vmem:[%s2581_s20 + $0x34] sm:$0xf0]  ;;  %v1763_v30 = vor.u32 %v1949_v25, %v1760_v26  ;;  %v1947_v31 = vld [vmem:[%s2581_s20 + $0x24] sm:$0xf] }
 0x166   : > { %927 = vmatpush.bf16.msra.mxu1 %v1787_v11  ;;  %v1752_v32 = vld [vmem:[%s2581_s20 + $0x28] sm:$0xf0]  ;;  %v1759_v33 = vor.u32 %v1950_v29, %v1758_v28  ;;  %v1750_v34 = vld [vmem:[%s2581_s20 + $0x20] sm:$0xf]  ;;  %v1948_v35 = vld [vmem:[%s2581_s20 + $0x24] sm:$0xf0] }
 0x167   : > { %914 = vmatpush.bf16.msra.mxu0 %v1783_v15  ;;  %v1755_v36 = vor.u32 %v1947_v31, %v1752_v32  ;;  %v1945_v37 = vld [vmem:[%s2581_s20 + $0x14] sm:$0xf]  ;;  %v1744_v38 = vld [vmem:[%s2581_s20 + $0x18] sm:$0xf0]  ;;  %v1751_v39 = vor.u32 %v1948_v35, %v1750_v34  ;;  %v1742_v40 = vld [vmem:[%s2581_s20 + $0x10] sm:$0xf] }
 0x168   : > { %v1946_v41 = vld [vmem:[%s2581_s20 + $0x14] sm:$0xf0]  ;;  %v1747_v42 = vor.u32 %v1945_v37, %v1744_v38  ;;  %v1943_v43 = vld [vmem:[%s2581_s20 + $0x4] sm:$0xf]  ;;  %v1736_v44 = vld [vmem:[%s2581_s20 + $0x8] sm:$0xf0] }
 0x169   : > { %v1743_v45 = vor.u32 %v1946_v41, %v1742_v40  ;;  %v1734_v46 = vld [vmem:[%s2581_s20] sm:$0xf]  ;;  %v1944_v47 = vld [vmem:[%s2581_s20 + $0x4] sm:$0xf0]  ;;  %v1739_v48 = vor.u32 %v1943_v43, %v1736_v44  ;;  %s2871_s27 = sld [smem:[#allocation31_spill]]  ;;  %vm954_vm2 = vcmask 1043456  }
 0x16a   : > { %928 = vmatpush.bf16.msra.mxu1 %v1779_v18  ;;  %v2720_v49 = vld [vmem:[#allocation2] sm:$0xff]  ;;  %v1735_v50 = vor.u32 %v1944_v47, %v1734_v46  ;;  %vm950_vm11 = vcmask 64512   ;;  %v1960_v63 = vld [vmem:[#allocation3] sm:$0xff]  ;;  %v1959_v3 = vld [vmem:[#allocation4] sm:$0xff]  ;;  %vm1190_vm4 = vcmask 130048   ;;  %p1936_p4 = scmp.ne.s32.totalorder %s2421_s22, 3 }
 0x16b   : > { %915 = vmatpush.bf16.msra.mxu0 %v1775_v21  ;;  %v2724_v51 = vpack.c.bf16 %v2720_v49, %v2720_v49  ;;  %v1000_v52 = vld [vmem:[%s2617_s13] sm:$0xff]  ;;  %v1968_v11 = vld [vmem:[%s2588_s18 + $0x38] sm:$0xff]  ;;  %v1967_v13 = vld [vmem:[%s2588_s18 + $0x30] sm:$0xff] }
 0x16c   : > { %v1001_v53 = vpack.c.bf16 %v1000_v52, %v1000_v52  ;;  %v1966_v16 = vld [vmem:[%s2588_s18 + $0x28] sm:$0xff]  ;;  %v1965_v21 = vld [vmem:[%s2588_s18 + $0x20] sm:$0xff]  ;;  %v1964_v26 = vld [vmem:[%s2588_s18 + $0x18] sm:$0xff] }
 0x16d   : > { %v1963_v31 = vld [vmem:[%s2588_s18 + $0x10] sm:$0xff] }
 0x16e   : > { %929 = vmatpush.bf16.msra.mxu1 %v1771_v24  ;;  %v1006_v56 = vsel %vm954_vm2, %v1001_v53, 0 }
 0x16f   : > { %916 = vmatpush.bf16.msra.mxu0 %v1767_v27  ;;  %v997_v54 = vld [vmem:[%s2871_s27] sm:$0xff]  ;;  %v998_v55 = vld [vmem:[%s2871_s27 + $0x8] sm:$0xff]  ;;  %1015 = vmatpush.bf16.msra.mxu2 %v1006_v56 }
 0x170   : > { %v999_v57 = vpack.c.bf16 %v998_v55, %v997_v54 }
 0x172   : > { %930 = vmatpush.bf16.msra.mxu1 %v1763_v30  ;;  %1806 = vmatmul.msk.bf16.vlgmr.msra.gmra.mxu2 %vm950_vm11, %v999_v57 }
 0x173   : > { %917 = vmatpush.bf16.msra.mxu0 %v1759_v33 }
 0x176   : > { %931 = vmatpush.bf16.msra.mxu1 %v1755_v36  ;;  %v1962_v36 = vld [vmem:[%s2588_s18 + $0x8] sm:$0xff] }
 0x177   : > { %918 = vmatpush.bf16.msra.mxu0 %v1751_v39  ;;  %v1042_v39 = vstv %s2640_s2 }
 0x17a   : > { %932 = vmatpush.bf16.msra.mxu1 %v1747_v42  ;;  %v1961_v42 = vld [vmem:[%s2588_s18] sm:$0xff] }
 0x17b   : > { %919 = vmatpush.bf16.msra.mxu0 %v1743_v45 }
 0x17e   : > { %933 = vmatpush.bf16.msra.mxu1 %v1739_v48 }
 0x17f   : > { %920 = vmatpush.bf16.msra.mxu0 %v1735_v50 }
 0x181   : > { %934 = vmatmul.bf16.vlgmr.msra.gmra.mxu1 %v2724_v51 }
 0x182   : > { %921 = vmatmul.bf16.vlgmr.msra.gmra.mxu0 %v2724_v51 }
 0x1f5   : > { %v1017_v9 = vpop.f32.mrf.mxu2 }
 0x1fd   : > { %v1019_v18 = vpop.f32.mrf.mxu2 }
 0x1fe   : > { %v935_v58 = vpop.f32.mrf.mxu1 }
 0x1ff   : > { %v940_v59 = vpack.c.bf16 %v935_v58, %v935_v58  ;;  %v922_v60 = vpop.f32.mrf.mxu0 }
 0x200   : > { %v939_v61 = vpack.c.bf16 %v922_v60, %v922_v60 }
 0x201   : > { %v956_v62 = vsel %vm954_vm2, %v940_v59, 0 }
 0x202   : > { %965 = vmatpush.bf16.msra.mxu3 %v956_v62  ;;  %v981_v0 = vsel %vm954_vm2, %v939_v61, 0 }
 0x205   : > { %1800 = vmatmul.msk.bf16.vlgmr.msra.gmra.mxu3 %vm950_vm11, %v1960_v63 }
 0x206   : > { %990 = vmatpush.bf16.msrb.mxu3 %v981_v0  ;;  %v937_v1 = vpop.f32.mrf.mxu1 }
 0x207   : > { %v924_v2 = vpop.f32.mrf.mxu0 }
 0x20a   : > { %1132 = vmatpush.bf16.msra.mxu3 %v1968_v11 }
 0x20e   : > { %1133 = vmatpush.bf16.msra.mxu3 %v1967_v13 }
 0x212   : > { %1134 = vmatpush.bf16.msra.mxu3 %v1966_v16 }
 0x215   : > { %1805 = vmatmul.msk.bf16.vlgmr.msrb.gmra.mxu3 %vm950_vm11, %v1959_v3 }
 0x216   : > { %1135 = vmatpush.bf16.msra.mxu3 %v1965_v21 }
 0x21a   : > { %1136 = vmatpush.bf16.msra.mxu3 %v1964_v26 }
 0x21e   : > { %1137 = vmatpush.bf16.msra.mxu3 %v1963_v31 }
 0x222   : > { %1138 = vmatpush.bf16.msra.mxu3 %v1962_v36  ;;  %v1983_v36 = vld [vmem:[%s2594_s30 + $0x70] sm:$0xff] }
 0x226   : > { %1139 = vmatpush.bf16.msra.mxu3 %v1961_v42  ;;  %v1981_v42 = vld [vmem:[%s2594_s30 + $0x60] sm:$0xff] }
 0x288   : > { %v967_v4 = vpop.f32.mrf.mxu3 }
 0x290   : > { %v969_v5 = vpop.f32.mrf.mxu3 }
 0x298   : > { %v992_v10 = vpop.f32.mrf.mxu3 }
 0x299   : > { %v993_v12 = vadd.f32 %v992_v10, %v967_v4 }
 0x29b   : > { %v1022_v14 = vadd.f32 %v1017_v9, %v993_v12 }
 0x29d   : > { %v1024_v19 = vmul.f32 %v2631_v7, %v1022_v14 }
 0x29f   : > { %v1033_v23 = vmul.f32 %v1024_v19, %v1024_v19 }
 0x2a0   : > { %v994_v15 = vpop.f32.mrf.mxu3 }
 0x2a1   : > { %v995_v17 = vadd.f32 %v994_v15, %v969_v5 }
 0x2a3   : > { %v1023_v20 = vadd.f32 %v1019_v18, %v995_v17 }
 0x2a5   : > { %v1025_v22 = vmul.f32 %v2636_v8, %v1023_v20 }
 0x2a7   : > { %v1026_v24 = vadd.f32 %v1025_v22, %v1024_v19  ;;  %v1034_v25 = vmul.f32 %v1025_v22, %v1025_v22 }
 0x2a9   : > { %v1027_v27 = vrot.slane %v1026_v24, 4  ;;  %v1035_v28 = vadd.f32 %v1034_v25, %v1033_v23 }
 0x2ab   : > { %v1028_v29 = vadd.f32 %v1027_v27, %v1026_v24  ;;  %v1036_v30 = vrot.slane %v1035_v28, 4 }
 0x2ad   : > { %v1029_v32 = vrot.slane %v1028_v29, 2  ;;  %v1037_v33 = vadd.f32 %v1036_v30, %v1035_v28 }
 0x2af   : > { %v1030_v34 = vadd.f32 %v1029_v32, %v1028_v29  ;;  %v1038_v35 = vrot.slane %v1037_v33, 2  ;;  %v1976_v32 = vld [vmem:[%s2594_s30 + $0x38] sm:$0xff] }
 0x2b0   : > { %1336 = vmatpush.bf16.msrb.mxu0 %v1976_v32 }
 0x2b1   : > { %v1031_v37 = vrot.slane %v1030_v34, 1  ;;  %v1039_v38 = vadd.f32 %v1038_v35, %v1037_v33  ;;  %v1984_v33 = vld [vmem:[%s2594_s30 + $0x78] sm:$0xff]  ;;  %v1975_v35 = vld [vmem:[%s2594_s30 + $0x30] sm:$0xff] }
 0x2b2   : > { %1349 = vmatpush.bf16.msrb.mxu1 %v1984_v33  ;;  %v1985_v33 = vld [vmem:[%s2596_s6] sm:$0xff] }
 0x2b3   : > { %v1032_v40 = vadd.f32 %v1031_v37, %v1030_v34  ;;  %v1040_v41 = vrot.slane %v1039_v38, 1  ;;  %v1974_v37 = vld [vmem:[%s2594_s30 + $0x28] sm:$0xff] }
 0x2b4   : > { %1337 = vmatpush.bf16.msrb.mxu0 %v1975_v35 }
 0x2b5   : > { %v1041_v43 = vadd.f32 %v1040_v41, %v1039_v38  ;;  %v1043_v44 = vmul.f32 %v1042_v39, %v1032_v40  ;;  %v1982_v38 = vld [vmem:[%s2594_s30 + $0x68] sm:$0xff]  ;;  %v1973_v41 = vld [vmem:[%s2594_s30 + $0x20] sm:$0xff] }
 0x2b6   : > { %1350 = vmatpush.bf16.msrb.mxu1 %v1983_v36 }
 0x2b7   : > { %v1044_v45 = vmul.f32 %v1042_v39, %v1041_v43  ;;  %v1045_v46 = vmul.f32 %v1043_v44, %v1043_v44  ;;  %v1048_v58 = vsub.f32 %v1022_v14, %v1043_v44  ;;  %v1049_v59 = vsub.f32 %v1023_v20, %v1043_v44 }
 0x2b8   : > { %1338 = vmatpush.bf16.msrb.mxu0 %v1974_v37 }
 0x2b9   : > { %v1046_v47 = vsub.f32 %v1044_v45, %v1045_v46  ;;  %v1972_v45 = vld [vmem:[%s2594_s30 + $0x18] sm:$0xff] }
 0x2ba   : > { %1351 = vmatpush.bf16.msrb.mxu1 %v1982_v38  ;;  %v1980_v46 = vld [vmem:[%s2594_s30 + $0x58] sm:$0xff] }
 0x2bb   : > { %v1047_v48 = vmax.f32 %v1046_v47, 0.0 }
 0x2bc   : > { %1339 = vmatpush.bf16.msrb.mxu0 %v1973_v41 }
 0x2bd   : > { %v1050_v50 = vadd.f32 1e-05, %v1047_v48 }
 0x2be   : > { %1352 = vmatpush.bf16.msrb.mxu1 %v1981_v42 }
 0x2bf   : > { %2087 = vrsqrt.f32 %v1050_v50  ;;  %vm1057_vm13 = vweird.f32 %v1050_v50 }
 0x2c0   : > { %1340 = vmatpush.bf16.msrb.mxu0 %v1972_v45 }
 0x2c2   : > { %1353 = vmatpush.bf16.msrb.mxu1 %v1980_v46 }
 0x2c5   : > { %v2088_v52 = vpop.eup %2087 }
 0x2c6   : > { %v1052_v53 = vmul.f32 %v2088_v52, %v1050_v50  ;;  %vm1058_vm12 = vweird.f32 %v2088_v52  ;;  %v1971_v50 = vld [vmem:[%s2594_s30 + $0x10] sm:$0xff] }
 0x2c7   : > { %vm1059_vm14 = vmor %vm1057_vm13, %vm1058_vm12  ;;  %1341 = vmatpush.bf16.msrb.mxu0 %v1971_v50 }
 0x2c8   : > { %v1053_v54 = vmul.f32 %v2088_v52, %v1052_v53 }
 0x2ca   : > { %v1054_v55 = vmul.f32 0.5, %v1053_v54 }
 0x2cc   : > { %v1055_v56 = vsub.f32 1.5, %v1054_v55 }
 0x2ce   : > { %v1056_v57 = vmul.f32 %v2088_v52, %v1055_v56 }
 0x2d0   : > { %v1060_v60 = vsel %vm1059_vm14, %v2088_v52, %v1056_v57  ;;  %v1979_v52 = vld [vmem:[%s2594_s30 + $0x50] sm:$0xff] }
 0x2d1   : > { %v1061_v61 = vmul.f32 %v1060_v60, %v1048_v58  ;;  %v1062_v62 = vmul.f32 %v1060_v60, %v1049_v59  ;;  %1354 = vmatpush.bf16.msrb.mxu1 %v1979_v52  ;;  %v1970_v58 = vld [vmem:[%s2594_s30 + $0x8] sm:$0xff] }
 0x2d2   : > { %v1978_v59 = vld [vmem:[%s2594_s30 + $0x48] sm:$0xff]  ;;  %1342 = vmatpush.bf16.msrb.mxu0 %v1970_v58 }
 0x2d3   : > { %v1063_v63 = vmax.f32 %v1061_v61, 0.0  ;;  %v1064_v0 = vmax.f32 %v1062_v62, 0.0 }
 0x2d5   : > { %v1066_v1 = vmul.f32 %v2636_v8, %v1064_v0  ;;  %v1065_v2 = vmul.f32 %v2631_v7, %v1063_v63  ;;  %1355 = vmatpush.bf16.msrb.mxu1 %v1978_v59 }
 0x2d7   : > { %v1067_v3 = vpack.c.bf16 %v1066_v1, %v1065_v2  ;;  %v1188_v1 = vld [vmem:[#allocation5] sm:$0xf]  ;;  %v1969_v2 = vld [vmem:[%s2594_s30] sm:$0xff] }
 0x2d8   : > { %1343 = vmatpush.bf16.msrb.mxu0 %v1969_v2 }
 0x2d9   : > { %1140 = vmatmul.bf16.vlgmr.msra.gmra.mxu3 %v1067_v3  ;;  %v1977_v3 = vld [vmem:[%s2594_s30 + $0x40] sm:$0xff]  ;;  %s2872_s30 = sld [smem:[#allocation34_spill]] (!%p1936_p4) }
 0x2da   : > { %1356 = vmatpush.bf16.msrb.mxu1 %v1977_v3 }
 0x2db   : > { %1344 = vmatmul.bf16.vlgmr.msrb.gmra.mxu0 %v2724_v51 }
 0x35c   : > { %v2748_v4 = vpop.f32.mrf.mxu3 }
 0x35d   : > { %v1146_v5 = vmul.f32 %v2631_v7, %v2748_v4 }
 0x35f   : > { %v1155_v11 = vmul.f32 %v1146_v5, %v1146_v5 }
 0x364   : > { %v1143_v9 = vpop.f32.mrf.mxu3 }
 0x365   : > { %v1147_v10 = vmul.f32 %v2636_v8, %v1143_v9 }
 0x367   : > { %v1148_v12 = vadd.f32 %v1147_v10, %v1146_v5  ;;  %v1156_v13 = vmul.f32 %v1147_v10, %v1147_v10  ;;  %v1345_v5 = vpop.f32.mrf.mxu0  ;;  %v1992_v10 = vld [vmem:[%s2596_s6 + $0x38] sm:$0xff] }
 0x369   : > { %v1149_v14 = vrot.slane %v1148_v12, 4  ;;  %v1157_v15 = vadd.f32 %v1156_v13, %v1155_v11  ;;  %v1991_v11 = vld [vmem:[%s2596_s6 + $0x30] sm:$0xff] }
 0x36b   : > { %v1150_v16 = vadd.f32 %v1149_v14, %v1148_v12  ;;  %v1158_v17 = vrot.slane %v1157_v15, 4  ;;  %v1990_v12 = vld [vmem:[%s2596_s6 + $0x28] sm:$0xff]  ;;  %v1989_v14 = vld [vmem:[%s2596_s6 + $0x20] sm:$0xff] }
 0x36d   : > { %v1151_v18 = vrot.slane %v1150_v16, 2  ;;  %v1159_v19 = vadd.f32 %v1158_v17, %v1157_v15 }
 0x36f   : > { %v1152_v20 = vadd.f32 %v1151_v18, %v1150_v16  ;;  %v1160_v21 = vrot.slane %v1159_v19, 2  ;;  %v1988_v16 = vld [vmem:[%s2596_s6 + $0x18] sm:$0xff] }
 0x371   : > { %v1153_v22 = vrot.slane %v1152_v20, 1  ;;  %v1161_v23 = vadd.f32 %v1160_v21, %v1159_v19 }
 0x373   : > { %v1154_v24 = vadd.f32 %v1153_v22, %v1152_v20  ;;  %v1162_v25 = vrot.slane %v1161_v23, 1  ;;  %v1987_v22 = vld [vmem:[%s2596_s6 + $0x10] sm:$0xff] }
 0x375   : > { %v1163_v26 = vadd.f32 %v1162_v25, %v1161_v23  ;;  %v1164_v27 = vmul.f32 %v1154_v24, %v1042_v39 }
 0x377   : > { %v1165_v28 = vmul.f32 %v1163_v26, %v1042_v39  ;;  %v1166_v29 = vmul.f32 %v1164_v27, %v1164_v27  ;;  %v1170_v53 = vsub.f32 %v1143_v9, %v1164_v27  ;;  %v1169_v54 = vsub.f32 %v2748_v4, %v1164_v27  ;;  %v1347_v9 = vpop.f32.mrf.mxu0  ;;  %v1986_v27 = vld [vmem:[%s2596_s6 + $0x8] sm:$0xff] }
 0x379   : > { %v1167_v30 = vsub.f32 %v1165_v28, %v1166_v29 }
 0x37b   : > { %v1168_v31 = vmax.f32 %v1167_v30, 0.0  ;;  %v1376_v30 = vstv %s2638_s3  ;;  %s2873_s3 = sld [smem:[#allocation35_spill]] (!%p1936_p4) }
 0x37d   : > { %v1171_v34 = vadd.f32 1e-05, %v1168_v31 }
 0x37f   : > { %2089 = vrsqrt.f32 %v1171_v34  ;;  %vm1178_vm0 = vweird.f32 %v1171_v34 }
 0x385   : > { %v2090_v39 = vpop.eup %2089 }
 0x386   : > { %v1173_v40 = vmul.f32 %v2090_v39, %v1171_v34  ;;  %vm1179_vm15 = vweird.f32 %v2090_v39 }
 0x387   : > { %vm1180_vm3 = vmor %vm1178_vm0, %vm1179_vm15 }
 0x388   : > { %v1174_v43 = vmul.f32 %v2090_v39, %v1173_v40 }
 0x38a   : > { %v1175_v44 = vmul.f32 0.5, %v1174_v43 }
 0x38c   : > { %v1176_v47 = vsub.f32 1.5, %v1175_v44 }
 0x38e   : > { %v1177_v48 = vmul.f32 %v2090_v39, %v1176_v47 }
 0x390   : > { %v1181_v55 = vsel %vm1180_vm3, %v2090_v39, %v1177_v48 }
 0x391   : > { %v1183_v56 = vmul.f32 %v1181_v55, %v1170_v53  ;;  %v1182_v57 = vmul.f32 %v1181_v55, %v1169_v54 }
 0x393   : > { %v1185_v60 = vmax.f32 %v1183_v56, 0.0  ;;  %v1184_v61 = vmax.f32 %v1182_v57, 0.0 }
 0x395   : > { %v1186_v62 = vmul.f32 %v2631_v7, %v1184_v61  ;;  %v1187_v63 = vmul.f32 %v2636_v8, %v1185_v60 }
 0x397   : > { %v1189_v0 = vpack.c.bf16 %v1187_v63, %v1186_v62 }
 0x399   : > { %1201 = vmatpush.bf16.msrb.mxu2 %v1189_v0 }
 0x39c   : > { %1839 = vmatmul.msk.bf16.vlgmr.msrb.gmra.mxu2 %vm1190_vm4, %v1188_v1 }
 0x39d   : > { %1462 = vmatpush.bf16.msra.mxu2 %v1992_v10 }
 0x3a1   : > { %1463 = vmatpush.bf16.msra.mxu2 %v1991_v11 }
 0x3a5   : > { %1464 = vmatpush.bf16.msra.mxu2 %v1990_v12 }
 0x3a9   : > { %1465 = vmatpush.bf16.msra.mxu2 %v1989_v14 }
 0x3ad   : > { %1466 = vmatpush.bf16.msra.mxu2 %v1988_v16 }
 0x3b1   : > { %1467 = vmatpush.bf16.msra.mxu2 %v1987_v22 }
 0x3b5   : > { %1468 = vmatpush.bf16.msra.mxu2 %v1986_v27 }
 0x3b9   : > { %1469 = vmatpush.bf16.msra.mxu2 %v1985_v33 }
 0x41f   : > { %v1203_v7 = vpop.f32.mrf.mxu2 }
 0x420   : > { %v1207_v4 = vpack.c.bf16 %v1203_v7, %v1203_v7 }
 0x422   : > { %1357 = vmatmul.bf16.vlgmr.msrb.gmra.mxu1 %v1207_v4 }
 0x427   : > { %v1205_v8 = vpop.f32.mrf.mxu2 }
 0x49f   : > { %v1358_v13 = vpop.f32.mrf.mxu1 }
 0x4a0   : > { %v1359_v51 = vadd.f32 %v1358_v13, %v1345_v5 }
 0x4a2   : > { %v1362_v15 = vmul.f32 %v2622_v6, %v1359_v51 }
 0x4a4   : > { %v1363_v17 = vrot.slane %v1362_v15, 4  ;;  %v1369_v18 = vmul.f32 %v1362_v15, %v1362_v15 }
 0x4a6   : > { %v1364_v19 = vadd.f32 %v1363_v17, %v1362_v15  ;;  %v1370_v20 = vrot.slane %v1369_v18, 4 }
 0x4a7   : > { %v1360_v21 = vpop.f32.mrf.mxu1 }
 0x4a8   : > { %v1365_v23 = vrot.slane %v1364_v19, 2  ;;  %v1371_v24 = vadd.f32 %v1370_v20, %v1369_v18 }
 0x4aa   : > { %v1366_v25 = vadd.f32 %v1365_v23, %v1364_v19  ;;  %v1372_v26 = vrot.slane %v1371_v24, 2 }
 0x4ac   : > { %v1367_v28 = vrot.slane %v1366_v25, 1  ;;  %v1373_v29 = vadd.f32 %v1372_v26, %v1371_v24 }
 0x4ae   : > { %v1368_v31 = vadd.f32 %v1367_v28, %v1366_v25  ;;  %v1374_v32 = vrot.slane %v1373_v29, 1 }
 0x4b0   : > { %v1375_v34 = vadd.f32 %v1374_v32, %v1373_v29  ;;  %v1377_v35 = vmul.f32 %v1376_v30, %v1368_v31 }
 0x4b2   : > { %v1378_v36 = vmul.f32 %v1376_v30, %v1375_v34  ;;  %v1379_v37 = vmul.f32 %v1377_v35, %v1377_v35  ;;  %v1382_v47 = vsub.f32 %v1359_v51, %v1377_v35 }
 0x4b4   : > { %v1380_v38 = vsub.f32 %v1378_v36, %v1379_v37 }
 0x4b6   : > { %v1381_v39 = vmax.f32 %v1380_v38, 0.0 }
 0x4b8   : > { %v1383_v40 = vadd.f32 1e-05, %v1381_v39 }
 0x4ba   : > { %2091 = vrsqrt.f32 %v1383_v40  ;;  %vm1390_vm6 = vweird.f32 %v1383_v40 }
 0x4c0   : > { %v2092_v41 = vpop.eup %2091 }
 0x4c1   : > { %v1385_v42 = vmul.f32 %v2092_v41, %v1383_v40  ;;  %vm1391_vm5 = vweird.f32 %v2092_v41 }
 0x4c2   : > { %vm1392_vm7 = vmor %vm1390_vm6, %vm1391_vm5 }
 0x4c3   : > { %v1386_v43 = vmul.f32 %v2092_v41, %v1385_v42 }
 0x4c5   : > { %v1387_v44 = vmul.f32 0.5, %v1386_v43 }
 0x4c7   : > { %v1388_v45 = vsub.f32 1.5, %v1387_v44 }
 0x4c9   : > { %v1389_v46 = vmul.f32 %v2092_v41, %v1388_v45 }
 0x4cb   : > { %v1393_v48 = vsel %vm1392_vm7, %v2092_v41, %v1389_v46 }
 0x4cc   : > { %v1394_v50 = vmul.f32 %v1393_v48, %v1382_v47 }
 0x4ce   : > { %v1395_v52 = vmax.f32 %v1394_v50, 0.0 }
 0x4d0   : > { %v1396_v53 = vmul.f32 %v2622_v6, %v1395_v52 }
 0x4d2   : > { %v1397_v54 = vpack.c.bf16 %v1396_v53, %v1396_v53 }
 0x4d4   : > { %1470 = vmatmul.bf16.vlgmr.msra.gmra.mxu2 %v1397_v54 }
 0x557   : > { %v1471_v55 = vpop.f32.mrf.mxu2 }
 0x558   : > { %v1475_v56 = vmul.f32 %v2622_v6, %v1471_v55 }
 0x55a   : > { %v1476_v57 = vrot.slane %v1475_v56, 4  ;;  %v1482_v58 = vmul.f32 %v1475_v56, %v1475_v56 }
 0x55c   : > { %v1477_v59 = vadd.f32 %v1476_v57, %v1475_v56  ;;  %v1483_v60 = vrot.slane %v1482_v58, 4 }
 0x55e   : > { %v1478_v61 = vrot.slane %v1477_v59, 2  ;;  %v1484_v62 = vadd.f32 %v1483_v60, %v1482_v58 }
 0x55f   : > { %v1473_v63 = vpop.f32.mrf.mxu2 }
 0x560   : > { %v1479_v0 = vadd.f32 %v1478_v61, %v1477_v59  ;;  %v1485_v1 = vrot.slane %v1484_v62, 2 }
 0x562   : > { %v1480_v2 = vrot.slane %v1479_v0, 1  ;;  %v1486_v3 = vadd.f32 %v1485_v1, %v1484_v62 }
 0x564   : > { %v1481_v7 = vadd.f32 %v1480_v2, %v1479_v0  ;;  %v1487_v4 = vrot.slane %v1486_v3, 1 }
 0x566   : > { %v1488_v8 = vadd.f32 %v1487_v4, %v1486_v3  ;;  %v1489_v5 = vmul.f32 %v1481_v7, %v1376_v30 }
 0x568   : > { %v1490_v9 = vmul.f32 %v1488_v8, %v1376_v30  ;;  %v1491_v10 = vmul.f32 %v1489_v5, %v1489_v5  ;;  %v1494_v19 = vsub.f32 %v1471_v55, %v1489_v5 }
 0x56a   : > { %v1492_v11 = vsub.f32 %v1490_v9, %v1491_v10 }
 0x56c   : > { %v1493_v12 = vmax.f32 %v1492_v11, 0.0 }
 0x56e   : > { %v1495_v13 = vadd.f32 1e-05, %v1493_v12 }
 0x570   : > { %2093 = vrsqrt.f32 %v1495_v13  ;;  %vm1502_vm9 = vweird.f32 %v1495_v13 }
 0x576   : > { %v2094_v14 = vpop.eup %2093 }
 0x577   : > { %v1497_v51 = vmul.f32 %v2094_v14, %v1495_v13  ;;  %vm1503_vm8 = vweird.f32 %v2094_v14 }
 0x578   : > { %vm1504_vm10 = vmor %vm1502_vm9, %vm1503_vm8 }
 0x579   : > { %v1498_v15 = vmul.f32 %v2094_v14, %v1497_v51 }
 0x57b   : > { %v1499_v16 = vmul.f32 0.5, %v1498_v15 }
 0x57d   : > { %v1500_v17 = vsub.f32 1.5, %v1499_v16 }
 0x57f   : > { %v1501_v18 = vmul.f32 %v2094_v14, %v1500_v17 }
 0x581   : > { %v1505_v20 = vsel %vm1504_vm10, %v2094_v14, %v1501_v18 }
 0x582   : > { %v1506_v21 = vmul.f32 %v1505_v20, %v1494_v19 }
 0x584   : > { %v1507_v22 = vmax.f32 %v1506_v21, 0.0 }
 0x586   : > { %v1508_v23 = vmul.f32 %v2622_v6, %v1507_v22  ;;  %1514 = sbr.rel (%p1936_p4) target bundleno = 1587 (0x633), region = 112 }
 0x588   : > { %v1509_v24 = vadd.f32 %v1508_v23, %v2720_v49 }
 0x58a   : > { %1510 = vst [vmem:[#allocation2] sm:$0xff] %v1509_v24 }
 0x58b   : > { %v1530_v25 = vld [vmem:[#allocation15 + $0x70] sm:$0xff]  ;;  %v1531_v26 = vld [vmem:[#allocation15 + $0x78] sm:$0xff]  ;;  %v1528_v27 = vld [vmem:[#allocation15 + $0x60] sm:$0xff]  ;;  %v1515_v47 = vpack.c.bf16 %v1509_v24, %v1509_v24 }
 0x58c   : > { %v1539_v28 = vpack.c.bf16 %v1531_v26, %v1530_v25  ;;  %v1529_v29 = vld [vmem:[#allocation15 + $0x68] sm:$0xff]  ;;  %v1526_v31 = vld [vmem:[#allocation15 + $0x50] sm:$0xff]  ;;  %v1527_v32 = vld [vmem:[#allocation15 + $0x58] sm:$0xff] }
 0x58d   : > { %v1538_v30 = vpack.c.bf16 %v1529_v29, %v1528_v27  ;;  %v1537_v33 = vpack.c.bf16 %v1527_v32, %v1526_v31  ;;  %v1524_v34 = vld [vmem:[#allocation15 + $0x40] sm:$0xff]  ;;  %v1525_v35 = vld [vmem:[#allocation15 + $0x48] sm:$0xff]  ;;  %v1522_v49 = vld [vmem:[#allocation15 + $0x30] sm:$0xff] }
 0x58e   : > { %1544 = vmatpush.bf16.msra.mxu0 %v1539_v28  ;;  %v1536_v6 = vpack.c.bf16 %v1525_v35, %v1524_v34  ;;  %v1523_v36 = vld [vmem:[#allocation15 + $0x38] sm:$0xff]  ;;  %v1520_v38 = vld [vmem:[#allocation15 + $0x20] sm:$0xff]  ;;  %v1521_v39 = vld [vmem:[#allocation15 + $0x28] sm:$0xff] }
 0x58f   : > { %v1535_v37 = vpack.c.bf16 %v1523_v36, %v1522_v49  ;;  %v1534_v40 = vpack.c.bf16 %v1521_v39, %v1520_v38  ;;  %v1518_v41 = vld [vmem:[#allocation15 + $0x10] sm:$0xff]  ;;  %v1519_v42 = vld [vmem:[#allocation15 + $0x18] sm:$0xff]  ;;  %v1516_v44 = vld [vmem:[#allocation15] sm:$0xff] }
 0x590   : > { %v1533_v43 = vpack.c.bf16 %v1519_v42, %v1518_v41  ;;  %v1517_v45 = vld [vmem:[#allocation15 + $0x8] sm:$0xff]  ;;  %v2095_v48 = vld [vmem:[%s2872_s30] ss:$0 sm:$0xff] }
 0x591   : > { %v1532_v46 = vpack.c.bf16 %v1517_v45, %v1516_v44 }
 0x592   : > { %1545 = vmatpush.bf16.msra.mxu0 %v1538_v30 }
 0x596   : > { %1546 = vmatpush.bf16.msra.mxu0 %v1537_v33 }
 0x59a   : > { %1547 = vmatpush.bf16.msra.mxu0 %v1536_v6 }
 0x59e   : > { %1548 = vmatpush.bf16.msra.mxu0 %v1535_v37 }
 0x5a2   : > { %1549 = vmatpush.bf16.msra.mxu0 %v1534_v40 }
 0x5a6   : > { %1550 = vmatpush.bf16.msra.mxu0 %v1533_v43 }
 0x5aa   : > { %1551 = vmatpush.bf16.msra.mxu0 %v1532_v46 }
 0x5ad   : > { %1552 = vmatmul.bf16.vlgmr.msra.gmra.mxu0 %v1515_v47 }
 0x62a   : > { %v1553_v50 = vpop.f32.mrf.mxu0 }
 0x62b   : > { %v1554_v52 = vadd.f32 %v2095_v48, %v1553_v50 }
 0x62d   : > { %1557 = vst [vmem:[%s2873_s3] sm:$0xff] %v1554_v52 }
 0x632   : > { %v1555_v53 = vpop.f32.mrf.mxu0 }
 0x633 PF: > { %s2874_s21 = sld [smem:[#allocation22_spill]]  ;;  %s2877_s18 = smov %s2303_s19 }
 0x634   : > { %s2875_s2 = sld [smem:[#allocation21_spill]] }
 0x635   : > { %s2876_s20 = sld [smem:[#allocation23_spill]] }
 0x639   : > { %p32_p0 = scmp.ge.s32.totalorder %s2874_s21, 6  }
 0x63a   : > { %s2878_s19 = smov %s2875_s2 }
 0x63b   :  { %34 = sbr.rel (!%p32_p0) target bundleno = 21 (0x15), region = 173 }
 0x640   :  { %1569 = vsyncpa [#allocation7], 1 }
 0x641   :  { %1571 = vsyncpa [#allocation7 + $0x1], 1 }
 0x642   :  { %1572 = vsyncpa [#allocation11], 1 }
 0x643   :  { %1574 = vsyncpa [#allocation11 + $0x1], 1 }
 0x644   :  { %1575 = vsyncpa [#allocation14], 1 }
 0x645   :  { %1577 = vsyncpa [#allocation14 + $0x1], 1 }
 0x646   :  { %1578 = vsyncpa [#allocation8], 1 }
 0x647   :  { %1580 = vsyncpa [#allocation8 + $0x1], 1 }

</bundles_post_ra>
